<compile_context>
chip_gen: v5e
topology: v5e:2x2
jax: 0.10.0
libtpu: 0.0.40
codegen_flags: <defaults>
</compile_context>

<pallas_src>
import functools

import jax
import jax.numpy as jnp
from jax.experimental import pallas as pl
from jax.experimental.pallas import tpu as pltpu


# ------------------------------ fused kernel ------------------------------- #

def _cognn_fused_kernel(
    x_ref, a_ref, gumbel_ref,
    enc_w_ref, enc_b_ref,
    ln_g_ref, ln_b_ref,
    aw1_ref, ab1_ref,
    aw2_ref, ab2_ref,
    ew_ref, eb_ref,
    dec_w_ref, dec_b_ref,
    out_ref,
    *, num_layers, skip):
    """One grid step == one graph.  All intermediates stay in VMEM/vregs."""
    f32 = jnp.float32
    bf16 = jnp.bfloat16

    x = x_ref[0]                     # (N, in_dim) f32
    a = a_ref[0]                     # (N, N) f32, A[v, u] = #edges u->v
    a_bf = a.astype(bf16)            # exact cast: small integer edge counts
    ln_g = ln_g_ref[...]
    ln_b = ln_b_ref[...]

    def _ln(v):                      # shared hidden_layer_norm (f32)
        mean = jnp.mean(v, axis=-1, keepdims=True)
        var = jnp.mean(jnp.square(v - mean), axis=-1, keepdims=True)
        return (v - mean) * jax.lax.rsqrt(var + 1e-5) * ln_g + ln_b

    # env_net[0] encoder: Linear + dropout(p=0) + ReLU.  bf16 operands, f32 acc.
    h = jnp.dot(x.astype(bf16), enc_w_ref[...],
                preferred_element_type=f32) + enc_b_ref[...]
    h = jnp.maximum(h, 0.0)

    aw1 = aw1_ref[...]; ab1 = ab1_ref[...]   # (2D, 2H), (1, 2H)  f32
    aw2 = aw2_ref[...]; ab2 = ab2_ref[...]   # (4H, 4),  (1, 4)   f32

    # Static unroll: num_layers is tiny here.
    # TODO(synk): for large num_layers / env_dim, stream ew/eb per-layer blocks
    # over an 'arbitrary' grid axis instead of keeping all L layers resident.
    for i in range(num_layers):
        h = _ln(h)

        # ---- in/out action nets, fused ------------------------------------
        # Both nets share one unweighted aggregation A @ h; each (root, neigh)
        # weight pair is packed along the contraction dim, so each stage is a
        # single wide MXU matmul: dot([h | A@h], [Ws; Wn]).  Kept in f32 so the
        # hard-gumbel argmax matches an f32 reference (no near-tie gate flips).
        msg0 = jnp.dot(a, h, preferred_element_type=f32)                # (N, D)
        h1 = jnp.maximum(
            jnp.dot(jnp.concatenate([h, msg0], axis=-1), aw1,
                    preferred_element_type=f32) + ab1, 0.0)             # (N, 2H)
        msg1 = jnp.dot(a, h1, preferred_element_type=f32)               # (N, 2H)
        logits = jnp.dot(jnp.concatenate([h1, msg1], axis=-1), aw2,
                         preferred_element_type=f32) + ab2              # (N, 4)

        # ---- hard gumbel-softmax routing -----------------------------------
        # F.gumbel_softmax(hard=True) forward value == one_hot(argmax(logits+g));
        # softmax and the positive temperature are monotone, so both are
        # skipped.  Only column 0 ("keep") of each one-hot is used downstream.
        z = logits + gumbel_ref[0, i]                                   # (N, 4)
        in_gate = (z[:, 0:1] >= z[:, 1:2]).astype(f32)                  # (N, 1)
        out_gate = (z[:, 2:3] >= z[:, 3:4]).astype(f32)                 # (N, 1)

        # ---- edge-gated env GraphConv --------------------------------------
        # edge_weight(u->v) = in_prob[v] * out_prob[u]
        #   => A_w @ h == in_gate * (A @ (out_gate * h))    (exact identity)
        # bf16 MXU operands, f32 accumulation; gating stays f32 on the VPU.
        msg_env = in_gate * jnp.dot(a_bf, (out_gate * h).astype(bf16),
                                    preferred_element_type=f32)
        out = jnp.maximum(
            jnp.dot(jnp.concatenate([h, msg_env], axis=-1).astype(bf16),
                    ew_ref[i], preferred_element_type=f32) + eb_ref[i], 0.0)

        h = h + out if skip else out

    # final LN -> global mean pool -> decoder.  mean(h) @ W == mean(h @ W)
    # (linearity); the N-row matmul fills the MXU instead of a 1-row product.
    h = _ln(h)
    res = jnp.mean(jnp.dot(h.astype(bf16), dec_w_ref[...],
                           preferred_element_type=f32),
                   axis=0, keepdims=True) + dec_b_ref[...]              # (1, out)
    out_ref[...] = res[None].astype(out_ref.dtype)


# ------------------------------- BlockSpecs -------------------------------- #

def _per_graph_block(arr):
    """Per-grid-step block: (1, <full trailing dims>) selected by the graph id."""
    nd = arr.ndim
    blk = (1,) + tuple(arr.shape[1:])
    return pl.BlockSpec(blk, lambda g, _nd=nd: (g,) + (0,) * (_nd - 1))


def _full_block(arr):
    """Whole-array VMEM-resident block (constant index across the grid)."""
    nd = arr.ndim
    return pl.BlockSpec(tuple(arr.shape), lambda g, _nd=nd: (0,) * _nd)


# ------------------------------- JAX glue ---------------------------------- #

def init_params(key, in_dim, env_dim, hidden_dim, out_dim, num_layers):
    keys = jax.random.split(key, 32)
    ki = iter(keys)

    def w(shape):
        return 0.1 * jax.random.normal(next(ki), shape, jnp.float32)

    def act_params():
        return {
            "ws1": w((env_dim, hidden_dim)), "wn1": w((env_dim, hidden_dim)),
            "b1": jnp.zeros((1, hidden_dim), jnp.float32),
            "ws2": w((hidden_dim, 2)), "wn2": w((hidden_dim, 2)),
            "b2": jnp.zeros((1, 2), jnp.float32),
        }

    in_act, out_act = act_params(), act_params()

    def block_diag2(m1, m2):
        z1 = jnp.zeros((m1.shape[0], m2.shape[1]), jnp.float32)
        z2 = jnp.zeros((m2.shape[0], m1.shape[1]), jnp.float32)
        return jnp.concatenate(
            [jnp.concatenate([m1, z1], axis=1),
             jnp.concatenate([z2, m2], axis=1)], axis=0)

    # ---- K-dim packed action-net weights ----------------------------------
    # layer 1: dot([h | A@h], [[ws1_in | ws1_out], [wn1_in | wn1_out]])
    aw1 = jnp.concatenate(
        [jnp.concatenate([in_act["ws1"], out_act["ws1"]], axis=1),
         jnp.concatenate([in_act["wn1"], out_act["wn1"]], axis=1)],
        axis=0)                                                        # (2D, 2H)
    ab1 = jnp.concatenate([in_act["b1"], out_act["b1"]], axis=1)       # (1, 2H)
    # layer 2: dot([h1 | A@h1], [blockdiag(ws2); blockdiag(wn2)]) -> 4 logits
    aw2 = jnp.concatenate(
        [block_diag2(in_act["ws2"], out_act["ws2"]),
         block_diag2(in_act["wn2"], out_act["wn2"])], axis=0)          # (4H, 4)
    ab2 = jnp.concatenate([in_act["b2"], out_act["b2"]], axis=1)       # (1, 4)

    # env GraphConv layers: packed [Ws; Wn] per layer, stored bf16 for the MXU.
    ew = jnp.stack([jnp.concatenate([w((env_dim, env_dim)),
                                     w((env_dim, env_dim))], axis=0)
                    for _ in range(num_layers)])                       # (L, 2D, D)
    eb = jnp.zeros((num_layers, 1, env_dim), jnp.float32)

    return {
        "enc_w": w((in_dim, env_dim)).astype(jnp.bfloat16),
        "enc_b": jnp.zeros((1, env_dim), jnp.float32),
        "dec_w": w((env_dim, out_dim)).astype(jnp.bfloat16),
        "dec_b": jnp.zeros((1, out_dim), jnp.float32),
        # single shared LayerNorm params, matching the reference's one
        # hidden_layer_norm module reused at every layer and before pooling.
        "ln_g": jnp.ones((1, env_dim), jnp.float32),
        "ln_b": jnp.zeros((1, env_dim), jnp.float32),
        "aw1": aw1, "ab1": ab1, "aw2": aw2, "ab2": ab2,
        "ew": ew.astype(jnp.bfloat16), "eb": eb,
    }


def cognn_forward(params, x, edge_index, key, num_layers, temp=0.5, skip=True):
    """Batched CoGNN forward (B independent graphs, one pallas_call).

    x:          (B, N, in_dim) node features
    edge_index: (B, 2, E) int edge lists (source row 0, target row 1)
    Returns (result (B, out_dim), edge_ratio (B, num_layers)).
    B = 1 recovers the reference single-graph forward (batch=None pooling).
    """
    b, n, in_dim = x.shape

    # Dense per-graph adjacency built once outside the kernel (scatter-add
    # keeps multi-edge "add" semantics of the reference message passing).
    def _adj(ei):
        u, v = ei[0], ei[1]
        return jnp.zeros((n, n), jnp.float32).at[v, u].add(1.0)
    a_unw = jax.vmap(_adj)(edge_index)                                 # (B, N, N)

    # Gumbel noise for all layers / both action nets (cols 0-1: in, 2-3: out).
    # hard gumbel-softmax forward == argmax(logits + g), temperature-invariant,
    # so `temp` is unused.  Kept host-side for parity with jax.random; it could
    # also be generated in-kernel via pltpu.prng_seed / prng_random_bits.
    # TODO(synk): learn_temp TempSoftPlus, edge/bond encoders (edge_attr) and
    # pestat positional encodings are not modeled (all disabled in this config).
    del temp
    u = jax.random.uniform(key, (b, num_layers, n, 4), jnp.float32,
                           minval=1e-6, maxval=1.0 - 1e-6)
    gumbel = -jnp.log(-jnp.log(u))

    operands = (x, a_unw, gumbel,
                params["enc_w"], params["enc_b"],
                params["ln_g"], params["ln_b"],
                params["aw1"], params["ab1"],
                params["aw2"], params["ab2"],
                params["ew"], params["eb"],
                params["dec_w"], params["dec_b"])

    # Explicit specs: per-graph blocks for the batched tensors, whole-array
    # (constant-index, VMEM-resident) blocks for the shared weights.
    in_specs = ([_per_graph_block(x), _per_graph_block(a_unw),
                 _per_graph_block(gumbel)]
                + [_full_block(op) for op in operands[3:]])

    env_dim = params["enc_w"].shape[-1]
    two_h = params["aw1"].shape[-1]
    out_dim = params["dec_w"].shape[-1]

    flops_per_graph = (
        2 * n * in_dim * env_dim
        + num_layers * (2 * n * n * env_dim             # action agg 1 (shared)
                        + 2 * n * 2 * env_dim * two_h   # action layer 1
                        + 2 * n * n * two_h             # action agg 2 (shared)
                        + 2 * n * 2 * two_h * 4         # action layer 2
                        + 2 * n * n * env_dim           # env gated aggregation
                        + 2 * n * 2 * env_dim * env_dim)  # env conv
        + 2 * n * env_dim * out_dim)
    bytes_accessed = sum(int(op.size) * op.dtype.itemsize for op in operands)
    bytes_accessed += b * out_dim * 4
    cost = pl.CostEstimate(flops=int(b * flops_per_graph),
                           transcendentals=int(b * n * (num_layers + 1)),
                           bytes_accessed=int(bytes_accessed))

    kernel = functools.partial(_cognn_fused_kernel,
                               num_layers=num_layers, skip=skip)
    result = pl.pallas_call(
        kernel,
        grid=(b,),
        in_specs=in_specs,
        out_specs=pl.BlockSpec((1, 1, out_dim), lambda g: (g, 0, 0)),
        out_shape=jax.ShapeDtypeStruct((b, 1, out_dim), jnp.float32),
        compiler_params=pltpu.CompilerParams(
            dimension_semantics=("parallel",)),   # v7x: shard graphs over 2 TCs
        cost_estimate=cost,
    )(*operands)

    # edge_ratio_node_mask is None -> -1 * ones(num_layers) per graph, as in
    # the reference.
    edge_ratio = -1.0 * jnp.ones((b, num_layers), jnp.float32)
    return result[:, 0, :], edge_ratio


if __name__ == "__main__":
    key = jax.random.PRNGKey(0)
    kx, ke, kp, kg = jax.random.split(key, 4)

    B, N, E = 4, 64, 128
    in_dim, env_dim, hidden_dim, out_dim, num_layers = 16, 32, 16, 8, 2

    x = jax.random.normal(kx, (B, N, in_dim), jnp.float32)
    edge_index = jax.random.randint(ke, (B, 2, E), 0, N)
    params = init_params(kp, in_dim, env_dim, hidden_dim, out_dim, num_layers)

    result, edge_ratio = cognn_forward(params, x, edge_index, kg, num_layers)
    jax.block_until_ready(result)
    jax.block_until_ready(edge_ratio)
    assert result.shape == (B, out_dim)
    assert edge_ratio.shape == (B, num_layers)
    print("KERNEL_OK")
</pallas_src>

<mosaic_0001>
module attributes {stable_mosaic.version = 11 : i64} {
  func.func @_cognn_fused_kernel(%arg0: i32, %arg1: memref<1x64x16xf32, #tpu.memory_space<vmem>>, %arg2: memref<1x64x64xf32, #tpu.memory_space<vmem>>, %arg3: memref<1x2x64x4xf32, #tpu.memory_space<vmem>>, %arg4: memref<16x32xbf16, #tpu.memory_space<vmem>>, %arg5: memref<1x32xf32, #tpu.memory_space<vmem>>, %arg6: memref<1x32xf32, #tpu.memory_space<vmem>>, %arg7: memref<1x32xf32, #tpu.memory_space<vmem>>, %arg8: memref<64x32xf32, #tpu.memory_space<vmem>>, %arg9: memref<1x32xf32, #tpu.memory_space<vmem>>, %arg10: memref<64x4xf32, #tpu.memory_space<vmem>>, %arg11: memref<1x4xf32, #tpu.memory_space<vmem>>, %arg12: memref<2x64x32xbf16, #tpu.memory_space<vmem>>, %arg13: memref<2x1x32xf32, #tpu.memory_space<vmem>>, %arg14: memref<32x8xbf16, #tpu.memory_space<vmem>>, %arg15: memref<1x8xf32, #tpu.memory_space<vmem>>, %arg16: memref<1x1x8xf32, #tpu.memory_space<vmem>>) attributes {dimension_semantics = [#tpu.dimension_semantics<parallel>], iteration_bounds = array<i64: 4>, scalar_prefetch = 0 : i64, scratch_operands = 0 : i64, tpu.core_type = #tpu.core_type<tc>, window_params = [{transform_indices = @transform_0, window_bounds = array<i64: 1, 64, 16>}, {transform_indices = @transform_1, window_bounds = array<i64: 1, 64, 64>}, {transform_indices = @transform_2, window_bounds = array<i64: 1, 2, 64, 4>}, {pipeline_mode = #tpu.pipeline_mode<synchronous>, transform_indices = @transform_3, window_bounds = array<i64: 16, 32>}, {pipeline_mode = #tpu.pipeline_mode<synchronous>, transform_indices = @transform_4, window_bounds = array<i64: 1, 32>}, {pipeline_mode = #tpu.pipeline_mode<synchronous>, transform_indices = @transform_5, window_bounds = array<i64: 1, 32>}, {pipeline_mode = #tpu.pipeline_mode<synchronous>, transform_indices = @transform_6, window_bounds = array<i64: 1, 32>}, {pipeline_mode = #tpu.pipeline_mode<synchronous>, transform_indices = @transform_7, window_bounds = array<i64: 64, 32>}, {pipeline_mode = #tpu.pipeline_mode<synchronous>, transform_indices = @transform_8, window_bounds = array<i64: 1, 32>}, {pipeline_mode = #tpu.pipeline_mode<synchronous>, transform_indices = @transform_9, window_bounds = array<i64: 64, 4>}, {pipeline_mode = #tpu.pipeline_mode<synchronous>, transform_indices = @transform_10, window_bounds = array<i64: 1, 4>}, {pipeline_mode = #tpu.pipeline_mode<synchronous>, transform_indices = @transform_11, window_bounds = array<i64: 2, 64, 32>}, {pipeline_mode = #tpu.pipeline_mode<synchronous>, transform_indices = @transform_12, window_bounds = array<i64: 2, 1, 32>}, {pipeline_mode = #tpu.pipeline_mode<synchronous>, transform_indices = @transform_13, window_bounds = array<i64: 32, 8>}, {pipeline_mode = #tpu.pipeline_mode<synchronous>, transform_indices = @transform_14, window_bounds = array<i64: 1, 8>}, {transform_indices = @transform_15, window_bounds = array<i64: 1, 1, 8>}]} {
    %c0 = arith.constant 0 : index
    %c0_0 = arith.constant 0 : index
    %c0_1 = arith.constant 0 : index
    %0 = vector.load %arg1[%c0, %c0_0, %c0_1] : memref<1x64x16xf32, #tpu.memory_space<vmem>>, vector<1x64x16xf32>
    %1 = vector.shape_cast %0 : vector<1x64x16xf32> to vector<64x16xf32>
    %c0_2 = arith.constant 0 : index
    %c0_3 = arith.constant 0 : index
    %c0_4 = arith.constant 0 : index
    %2 = vector.load %arg2[%c0_2, %c0_3, %c0_4] : memref<1x64x64xf32, #tpu.memory_space<vmem>>, vector<1x64x64xf32>
    %3 = vector.shape_cast %2 : vector<1x64x64xf32> to vector<64x64xf32>
    %4 = arith.truncf %3 : vector<64x64xf32> to vector<64x64xbf16>
    %c0_5 = arith.constant 0 : index
    %c0_6 = arith.constant 0 : index
    %5 = vector.load %arg6[%c0_5, %c0_6] : memref<1x32xf32, #tpu.memory_space<vmem>>, vector<1x32xf32>
    %c0_7 = arith.constant 0 : index
    %c0_8 = arith.constant 0 : index
    %6 = vector.load %arg7[%c0_7, %c0_8] : memref<1x32xf32, #tpu.memory_space<vmem>>, vector<1x32xf32>
    %7 = arith.truncf %1 : vector<64x16xf32> to vector<64x16xbf16>
    %c0_9 = arith.constant 0 : index
    %c0_10 = arith.constant 0 : index
    %8 = vector.load %arg4[%c0_9, %c0_10] : memref<16x32xbf16, #tpu.memory_space<vmem>>, vector<16x32xbf16>
    %cst = arith.constant dense<0.000000e+00> : vector<64x32xf32>
    %9 = tpu.matmul %7, %8, %cst {dimension_numbers = #tpu.dot_dimension_numbers<[1], [0], [0], [1], [0, 0, 1, 1], [], []>} : vector<64x16xbf16>, vector<16x32xbf16>, vector<64x32xf32> -> vector<64x32xf32>
    %c0_11 = arith.constant 0 : index
    %c0_12 = arith.constant 0 : index
    %10 = vector.load %arg5[%c0_11, %c0_12] : memref<1x32xf32, #tpu.memory_space<vmem>>, vector<1x32xf32>
    %11 = vector.broadcast %10 : vector<1x32xf32> to vector<64x32xf32>
    %12 = arith.addf %9, %11 : vector<64x32xf32>
    %cst_13 = arith.constant 0.000000e+00 : f32
    %13 = vector.broadcast %cst_13 : f32 to vector<64x32xf32>
    %14 = arith.maximumf %12, %13 : vector<64x32xf32>
    %c0_14 = arith.constant 0 : index
    %c0_15 = arith.constant 0 : index
    %15 = vector.load %arg8[%c0_14, %c0_15] : memref<64x32xf32, #tpu.memory_space<vmem>>, vector<64x32xf32>
    %c0_16 = arith.constant 0 : index
    %c0_17 = arith.constant 0 : index
    %16 = vector.load %arg9[%c0_16, %c0_17] : memref<1x32xf32, #tpu.memory_space<vmem>>, vector<1x32xf32>
    %c0_18 = arith.constant 0 : index
    %c0_19 = arith.constant 0 : index
    %17 = vector.load %arg10[%c0_18, %c0_19] : memref<64x4xf32, #tpu.memory_space<vmem>>, vector<64x4xf32>
    %c0_20 = arith.constant 0 : index
    %c0_21 = arith.constant 0 : index
    %18 = vector.load %arg11[%c0_20, %c0_21] : memref<1x4xf32, #tpu.memory_space<vmem>>, vector<1x4xf32>
    %cst_22 = arith.constant dense<0.000000e+00> : vector<64xf32>
    %19 = vector.multi_reduction <add>, %14, %cst_22 [1] : vector<64x32xf32> to vector<64xf32>
    %20 = vector.shape_cast %19 : vector<64xf32> to vector<64x1xf32>
    %cst_23 = arith.constant 3.200000e+01 : f32
    %21 = vector.broadcast %cst_23 : f32 to vector<64x1xf32>
    %22 = arith.divf %20, %21 : vector<64x1xf32>
    %23 = vector.broadcast %22 : vector<64x1xf32> to vector<64x32xf32>
    %24 = arith.subf %14, %23 : vector<64x32xf32>
    %25 = arith.mulf %24, %24 : vector<64x32xf32>
    %cst_24 = arith.constant dense<0.000000e+00> : vector<64xf32>
    %26 = vector.multi_reduction <add>, %25, %cst_24 [1] : vector<64x32xf32> to vector<64xf32>
    %27 = vector.shape_cast %26 : vector<64xf32> to vector<64x1xf32>
    %cst_25 = arith.constant 3.200000e+01 : f32
    %28 = vector.broadcast %cst_25 : f32 to vector<64x1xf32>
    %29 = arith.divf %27, %28 : vector<64x1xf32>
    %30 = vector.broadcast %22 : vector<64x1xf32> to vector<64x32xf32>
    %31 = arith.subf %14, %30 : vector<64x32xf32>
    %cst_26 = arith.constant 9.99999974E-6 : f32
    %32 = vector.broadcast %cst_26 : f32 to vector<64x1xf32>
    %33 = arith.addf %29, %32 : vector<64x1xf32>
    %34 = math.rsqrt %33 : vector<64x1xf32>
    %35 = vector.broadcast %34 : vector<64x1xf32> to vector<64x32xf32>
    %36 = arith.mulf %31, %35 : vector<64x32xf32>
    %37 = vector.broadcast %5 : vector<1x32xf32> to vector<64x32xf32>
    %38 = arith.mulf %36, %37 : vector<64x32xf32>
    %39 = vector.broadcast %6 : vector<1x32xf32> to vector<64x32xf32>
    %40 = arith.addf %38, %39 : vector<64x32xf32>
    %cst_27 = arith.constant dense<0.000000e+00> : vector<64x32xf32>
    %41 = tpu.matmul %3, %40, %cst_27 {dimension_numbers = #tpu.dot_dimension_numbers<[1], [0], [0], [1], [0, 0, 1, 1], [], []>} : vector<64x64xf32>, vector<64x32xf32>, vector<64x32xf32> -> vector<64x32xf32>
    %42 = tpu.concatenate %40, %41 in 1 : vector<64x32xf32>, vector<64x32xf32> -> vector<64x64xf32>
    %cst_28 = arith.constant dense<0.000000e+00> : vector<64x32xf32>
    %43 = tpu.matmul %42, %15, %cst_28 {dimension_numbers = #tpu.dot_dimension_numbers<[1], [0], [0], [1], [0, 0, 1, 1], [], []>} : vector<64x64xf32>, vector<64x32xf32>, vector<64x32xf32> -> vector<64x32xf32>
    %44 = vector.broadcast %16 : vector<1x32xf32> to vector<64x32xf32>
    %45 = arith.addf %43, %44 : vector<64x32xf32>
    %cst_29 = arith.constant 0.000000e+00 : f32
    %46 = vector.broadcast %cst_29 : f32 to vector<64x32xf32>
    %47 = arith.maximumf %45, %46 : vector<64x32xf32>
    %cst_30 = arith.constant dense<0.000000e+00> : vector<64x32xf32>
    %48 = tpu.matmul %3, %47, %cst_30 {dimension_numbers = #tpu.dot_dimension_numbers<[1], [0], [0], [1], [0, 0, 1, 1], [], []>} : vector<64x64xf32>, vector<64x32xf32>, vector<64x32xf32> -> vector<64x32xf32>
    %49 = tpu.concatenate %47, %48 in 1 : vector<64x32xf32>, vector<64x32xf32> -> vector<64x64xf32>
    %cst_31 = arith.constant dense<0.000000e+00> : vector<64x4xf32>
    %50 = tpu.matmul %49, %17, %cst_31 {dimension_numbers = #tpu.dot_dimension_numbers<[1], [0], [0], [1], [0, 0, 1, 1], [], []>} : vector<64x64xf32>, vector<64x4xf32>, vector<64x4xf32> -> vector<64x4xf32>
    %51 = vector.broadcast %18 : vector<1x4xf32> to vector<64x4xf32>
    %52 = arith.addf %50, %51 : vector<64x4xf32>
    %c0_32 = arith.constant 0 : index
    %c0_33 = arith.constant 0 : index
    %c0_34 = arith.constant 0 : index
    %c0_35 = arith.constant 0 : index
    %53 = vector.load %arg3[%c0_32, %c0_33, %c0_34, %c0_35] : memref<1x2x64x4xf32, #tpu.memory_space<vmem>>, vector<1x1x64x4xf32>
    %54 = vector.shape_cast %53 : vector<1x1x64x4xf32> to vector<64x4xf32>
    %55 = arith.addf %52, %54 : vector<64x4xf32>
    %56 = vector.extract_strided_slice %55 {offsets = [0, 0], sizes = [64, 1], strides = [1, 1]} : vector<64x4xf32> to vector<64x1xf32>
    %57 = vector.extract_strided_slice %55 {offsets = [0, 1], sizes = [64, 1], strides = [1, 1]} : vector<64x4xf32> to vector<64x1xf32>
    %58 = arith.cmpf oge, %56, %57 : vector<64x1xf32>
    %59 = arith.extui %58 : vector<64x1xi1> to vector<64x1xi32>
    %60 = arith.sitofp %59 : vector<64x1xi32> to vector<64x1xf32>
    %61 = vector.extract_strided_slice %55 {offsets = [0, 2], sizes = [64, 1], strides = [1, 1]} : vector<64x4xf32> to vector<64x1xf32>
    %62 = vector.extract_strided_slice %55 {offsets = [0, 3], sizes = [64, 1], strides = [1, 1]} : vector<64x4xf32> to vector<64x1xf32>
    %63 = arith.cmpf oge, %61, %62 : vector<64x1xf32>
    %64 = arith.extui %63 : vector<64x1xi1> to vector<64x1xi32>
    %65 = arith.sitofp %64 : vector<64x1xi32> to vector<64x1xf32>
    %66 = vector.broadcast %65 : vector<64x1xf32> to vector<64x32xf32>
    %67 = arith.mulf %66, %40 : vector<64x32xf32>
    %68 = arith.truncf %67 : vector<64x32xf32> to vector<64x32xbf16>
    %cst_36 = arith.constant dense<0.000000e+00> : vector<64x32xf32>
    %69 = tpu.matmul %4, %68, %cst_36 {dimension_numbers = #tpu.dot_dimension_numbers<[1], [0], [0], [1], [0, 0, 1, 1], [], []>} : vector<64x64xbf16>, vector<64x32xbf16>, vector<64x32xf32> -> vector<64x32xf32>
    %70 = vector.broadcast %60 : vector<64x1xf32> to vector<64x32xf32>
    %71 = arith.mulf %70, %69 : vector<64x32xf32>
    %72 = tpu.concatenate %40, %71 in 1 : vector<64x32xf32>, vector<64x32xf32> -> vector<64x64xf32>
    %73 = arith.truncf %72 : vector<64x64xf32> to vector<64x64xbf16>
    %c0_37 = arith.constant 0 : index
    %c0_38 = arith.constant 0 : index
    %c0_39 = arith.constant 0 : index
    %74 = vector.load %arg12[%c0_37, %c0_38, %c0_39] : memref<2x64x32xbf16, #tpu.memory_space<vmem>>, vector<1x64x32xbf16>
    %75 = vector.shape_cast %74 : vector<1x64x32xbf16> to vector<64x32xbf16>
    %cst_40 = arith.constant dense<0.000000e+00> : vector<64x32xf32>
    %76 = tpu.matmul %73, %75, %cst_40 {dimension_numbers = #tpu.dot_dimension_numbers<[1], [0], [0], [1], [0, 0, 1, 1], [], []>} : vector<64x64xbf16>, vector<64x32xbf16>, vector<64x32xf32> -> vector<64x32xf32>
    %c0_41 = arith.constant 0 : index
    %c0_42 = arith.constant 0 : index
    %c0_43 = arith.constant 0 : index
    %77 = vector.load %arg13[%c0_41, %c0_42, %c0_43] : memref<2x1x32xf32, #tpu.memory_space<vmem>>, vector<1x1x32xf32>
    %78 = vector.shape_cast %77 : vector<1x1x32xf32> to vector<1x32xf32>
    %79 = vector.broadcast %78 : vector<1x32xf32> to vector<64x32xf32>
    %80 = arith.addf %76, %79 : vector<64x32xf32>
    %cst_44 = arith.constant 0.000000e+00 : f32
    %81 = vector.broadcast %cst_44 : f32 to vector<64x32xf32>
    %82 = arith.maximumf %80, %81 : vector<64x32xf32>
    %83 = arith.addf %40, %82 : vector<64x32xf32>
    %cst_45 = arith.constant dense<0.000000e+00> : vector<64xf32>
    %84 = vector.multi_reduction <add>, %83, %cst_45 [1] : vector<64x32xf32> to vector<64xf32>
    %85 = vector.shape_cast %84 : vector<64xf32> to vector<64x1xf32>
    %cst_46 = arith.constant 3.200000e+01 : f32
    %86 = vector.broadcast %cst_46 : f32 to vector<64x1xf32>
    %87 = arith.divf %85, %86 : vector<64x1xf32>
    %88 = vector.broadcast %87 : vector<64x1xf32> to vector<64x32xf32>
    %89 = arith.subf %83, %88 : vector<64x32xf32>
    %90 = arith.mulf %89, %89 : vector<64x32xf32>
    %cst_47 = arith.constant dense<0.000000e+00> : vector<64xf32>
    %91 = vector.multi_reduction <add>, %90, %cst_47 [1] : vector<64x32xf32> to vector<64xf32>
    %92 = vector.shape_cast %91 : vector<64xf32> to vector<64x1xf32>
    %cst_48 = arith.constant 3.200000e+01 : f32
    %93 = vector.broadcast %cst_48 : f32 to vector<64x1xf32>
    %94 = arith.divf %92, %93 : vector<64x1xf32>
    %95 = vector.broadcast %87 : vector<64x1xf32> to vector<64x32xf32>
    %96 = arith.subf %83, %95 : vector<64x32xf32>
    %cst_49 = arith.constant 9.99999974E-6 : f32
    %97 = vector.broadcast %cst_49 : f32 to vector<64x1xf32>
    %98 = arith.addf %94, %97 : vector<64x1xf32>
    %99 = math.rsqrt %98 : vector<64x1xf32>
    %100 = vector.broadcast %99 : vector<64x1xf32> to vector<64x32xf32>
    %101 = arith.mulf %96, %100 : vector<64x32xf32>
    %102 = vector.broadcast %5 : vector<1x32xf32> to vector<64x32xf32>
    %103 = arith.mulf %101, %102 : vector<64x32xf32>
    %104 = vector.broadcast %6 : vector<1x32xf32> to vector<64x32xf32>
    %105 = arith.addf %103, %104 : vector<64x32xf32>
    %cst_50 = arith.constant dense<0.000000e+00> : vector<64x32xf32>
    %106 = tpu.matmul %3, %105, %cst_50 {dimension_numbers = #tpu.dot_dimension_numbers<[1], [0], [0], [1], [0, 0, 1, 1], [], []>} : vector<64x64xf32>, vector<64x32xf32>, vector<64x32xf32> -> vector<64x32xf32>
    %107 = tpu.concatenate %105, %106 in 1 : vector<64x32xf32>, vector<64x32xf32> -> vector<64x64xf32>
    %cst_51 = arith.constant dense<0.000000e+00> : vector<64x32xf32>
    %108 = tpu.matmul %107, %15, %cst_51 {dimension_numbers = #tpu.dot_dimension_numbers<[1], [0], [0], [1], [0, 0, 1, 1], [], []>} : vector<64x64xf32>, vector<64x32xf32>, vector<64x32xf32> -> vector<64x32xf32>
    %109 = vector.broadcast %16 : vector<1x32xf32> to vector<64x32xf32>
    %110 = arith.addf %108, %109 : vector<64x32xf32>
    %cst_52 = arith.constant 0.000000e+00 : f32
    %111 = vector.broadcast %cst_52 : f32 to vector<64x32xf32>
    %112 = arith.maximumf %110, %111 : vector<64x32xf32>
    %cst_53 = arith.constant dense<0.000000e+00> : vector<64x32xf32>
    %113 = tpu.matmul %3, %112, %cst_53 {dimension_numbers = #tpu.dot_dimension_numbers<[1], [0], [0], [1], [0, 0, 1, 1], [], []>} : vector<64x64xf32>, vector<64x32xf32>, vector<64x32xf32> -> vector<64x32xf32>
    %114 = tpu.concatenate %112, %113 in 1 : vector<64x32xf32>, vector<64x32xf32> -> vector<64x64xf32>
    %cst_54 = arith.constant dense<0.000000e+00> : vector<64x4xf32>
    %115 = tpu.matmul %114, %17, %cst_54 {dimension_numbers = #tpu.dot_dimension_numbers<[1], [0], [0], [1], [0, 0, 1, 1], [], []>} : vector<64x64xf32>, vector<64x4xf32>, vector<64x4xf32> -> vector<64x4xf32>
    %116 = vector.broadcast %18 : vector<1x4xf32> to vector<64x4xf32>
    %117 = arith.addf %115, %116 : vector<64x4xf32>
    %c0_55 = arith.constant 0 : index
    %c1 = arith.constant 1 : index
    %c0_56 = arith.constant 0 : index
    %c0_57 = arith.constant 0 : index
    %118 = vector.load %arg3[%c0_55, %c1, %c0_56, %c0_57] : memref<1x2x64x4xf32, #tpu.memory_space<vmem>>, vector<1x1x64x4xf32>
    %119 = vector.shape_cast %118 : vector<1x1x64x4xf32> to vector<64x4xf32>
    %120 = arith.addf %117, %119 : vector<64x4xf32>
    %121 = vector.extract_strided_slice %120 {offsets = [0, 0], sizes = [64, 1], strides = [1, 1]} : vector<64x4xf32> to vector<64x1xf32>
    %122 = vector.extract_strided_slice %120 {offsets = [0, 1], sizes = [64, 1], strides = [1, 1]} : vector<64x4xf32> to vector<64x1xf32>
    %123 = arith.cmpf oge, %121, %122 : vector<64x1xf32>
    %124 = arith.extui %123 : vector<64x1xi1> to vector<64x1xi32>
    %125 = arith.sitofp %124 : vector<64x1xi32> to vector<64x1xf32>
    %126 = vector.extract_strided_slice %120 {offsets = [0, 2], sizes = [64, 1], strides = [1, 1]} : vector<64x4xf32> to vector<64x1xf32>
    %127 = vector.extract_strided_slice %120 {offsets = [0, 3], sizes = [64, 1], strides = [1, 1]} : vector<64x4xf32> to vector<64x1xf32>
    %128 = arith.cmpf oge, %126, %127 : vector<64x1xf32>
    %129 = arith.extui %128 : vector<64x1xi1> to vector<64x1xi32>
    %130 = arith.sitofp %129 : vector<64x1xi32> to vector<64x1xf32>
    %131 = vector.broadcast %130 : vector<64x1xf32> to vector<64x32xf32>
    %132 = arith.mulf %131, %105 : vector<64x32xf32>
    %133 = arith.truncf %132 : vector<64x32xf32> to vector<64x32xbf16>
    %cst_58 = arith.constant dense<0.000000e+00> : vector<64x32xf32>
    %134 = tpu.matmul %4, %133, %cst_58 {dimension_numbers = #tpu.dot_dimension_numbers<[1], [0], [0], [1], [0, 0, 1, 1], [], []>} : vector<64x64xbf16>, vector<64x32xbf16>, vector<64x32xf32> -> vector<64x32xf32>
    %135 = vector.broadcast %125 : vector<64x1xf32> to vector<64x32xf32>
    %136 = arith.mulf %135, %134 : vector<64x32xf32>
    %137 = tpu.concatenate %105, %136 in 1 : vector<64x32xf32>, vector<64x32xf32> -> vector<64x64xf32>
    %138 = arith.truncf %137 : vector<64x64xf32> to vector<64x64xbf16>
    %c1_59 = arith.constant 1 : index
    %c0_60 = arith.constant 0 : index
    %c0_61 = arith.constant 0 : index
    %139 = vector.load %arg12[%c1_59, %c0_60, %c0_61] : memref<2x64x32xbf16, #tpu.memory_space<vmem>>, vector<1x64x32xbf16>
    %140 = vector.shape_cast %139 : vector<1x64x32xbf16> to vector<64x32xbf16>
    %cst_62 = arith.constant dense<0.000000e+00> : vector<64x32xf32>
    %141 = tpu.matmul %138, %140, %cst_62 {dimension_numbers = #tpu.dot_dimension_numbers<[1], [0], [0], [1], [0, 0, 1, 1], [], []>} : vector<64x64xbf16>, vector<64x32xbf16>, vector<64x32xf32> -> vector<64x32xf32>
    %c1_63 = arith.constant 1 : index
    %c0_64 = arith.constant 0 : index
    %c0_65 = arith.constant 0 : index
    %142 = vector.load %arg13[%c1_63, %c0_64, %c0_65] : memref<2x1x32xf32, #tpu.memory_space<vmem>>, vector<1x1x32xf32>
    %143 = vector.shape_cast %142 : vector<1x1x32xf32> to vector<1x32xf32>
    %144 = vector.broadcast %143 : vector<1x32xf32> to vector<64x32xf32>
    %145 = arith.addf %141, %144 : vector<64x32xf32>
    %cst_66 = arith.constant 0.000000e+00 : f32
    %146 = vector.broadcast %cst_66 : f32 to vector<64x32xf32>
    %147 = arith.maximumf %145, %146 : vector<64x32xf32>
    %148 = arith.addf %105, %147 : vector<64x32xf32>
    %cst_67 = arith.constant dense<0.000000e+00> : vector<64xf32>
    %149 = vector.multi_reduction <add>, %148, %cst_67 [1] : vector<64x32xf32> to vector<64xf32>
    %150 = vector.shape_cast %149 : vector<64xf32> to vector<64x1xf32>
    %cst_68 = arith.constant 3.200000e+01 : f32
    %151 = vector.broadcast %cst_68 : f32 to vector<64x1xf32>
    %152 = arith.divf %150, %151 : vector<64x1xf32>
    %153 = vector.broadcast %152 : vector<64x1xf32> to vector<64x32xf32>
    %154 = arith.subf %148, %153 : vector<64x32xf32>
    %155 = arith.mulf %154, %154 : vector<64x32xf32>
    %cst_69 = arith.constant dense<0.000000e+00> : vector<64xf32>
    %156 = vector.multi_reduction <add>, %155, %cst_69 [1] : vector<64x32xf32> to vector<64xf32>
    %157 = vector.shape_cast %156 : vector<64xf32> to vector<64x1xf32>
    %cst_70 = arith.constant 3.200000e+01 : f32
    %158 = vector.broadcast %cst_70 : f32 to vector<64x1xf32>
    %159 = arith.divf %157, %158 : vector<64x1xf32>
    %160 = vector.broadcast %152 : vector<64x1xf32> to vector<64x32xf32>
    %161 = arith.subf %148, %160 : vector<64x32xf32>
    %cst_71 = arith.constant 9.99999974E-6 : f32
    %162 = vector.broadcast %cst_71 : f32 to vector<64x1xf32>
    %163 = arith.addf %159, %162 : vector<64x1xf32>
    %164 = math.rsqrt %163 : vector<64x1xf32>
    %165 = vector.broadcast %164 : vector<64x1xf32> to vector<64x32xf32>
    %166 = arith.mulf %161, %165 : vector<64x32xf32>
    %167 = vector.broadcast %5 : vector<1x32xf32> to vector<64x32xf32>
    %168 = arith.mulf %166, %167 : vector<64x32xf32>
    %169 = vector.broadcast %6 : vector<1x32xf32> to vector<64x32xf32>
    %170 = arith.addf %168, %169 : vector<64x32xf32>
    %171 = arith.truncf %170 : vector<64x32xf32> to vector<64x32xbf16>
    %c0_72 = arith.constant 0 : index
    %c0_73 = arith.constant 0 : index
    %172 = vector.load %arg14[%c0_72, %c0_73] : memref<32x8xbf16, #tpu.memory_space<vmem>>, vector<32x8xbf16>
    %cst_74 = arith.constant dense<0.000000e+00> : vector<64x8xf32>
    %173 = tpu.matmul %171, %172, %cst_74 {dimension_numbers = #tpu.dot_dimension_numbers<[1], [0], [0], [1], [0, 0, 1, 1], [], []>} : vector<64x32xbf16>, vector<32x8xbf16>, vector<64x8xf32> -> vector<64x8xf32>
    %cst_75 = arith.constant dense<0.000000e+00> : vector<8xf32>
    %174 = vector.multi_reduction <add>, %173, %cst_75 [0] : vector<64x8xf32> to vector<8xf32>
    %175 = vector.shape_cast %174 : vector<8xf32> to vector<1x8xf32>
    %cst_76 = arith.constant 6.400000e+01 : f32
    %176 = vector.broadcast %cst_76 : f32 to vector<1x8xf32>
    %177 = arith.divf %175, %176 : vector<1x8xf32>
    %c0_77 = arith.constant 0 : index
    %c0_78 = arith.constant 0 : index
    %178 = vector.load %arg15[%c0_77, %c0_78] : memref<1x8xf32, #tpu.memory_space<vmem>>, vector<1x8xf32>
    %179 = arith.addf %177, %178 : vector<1x8xf32>
    %180 = vector.shape_cast %179 : vector<1x8xf32> to vector<1x1x8xf32>
    %c0_79 = arith.constant 0 : index
    %c0_80 = arith.constant 0 : index
    %c0_81 = arith.constant 0 : index
    %181 = vector.load %arg16[%c0_79, %c0_80, %c0_81] : memref<1x1x8xf32, #tpu.memory_space<vmem>>, vector<1x1x8xf32>
    tpu.vector_store %arg16[%c0_79, %c0_80, %c0_81], %180 {strides = array<i32>} : memref<1x1x8xf32, #tpu.memory_space<vmem>>, vector<1x1x8xf32>,
    return
  }
  func.func @transform_0(%arg0: i32) -> (i32, i32, i32) {
    %c0_i32 = arith.constant 0 : i32
    %c0_i32_0 = arith.constant 0 : i32
    %c0_i32_1 = arith.constant 0 : i32
    return %arg0, %c0_i32, %c0_i32_0 : i32, i32, i32
  }
  func.func @transform_1(%arg0: i32) -> (i32, i32, i32) {
    %c0_i32 = arith.constant 0 : i32
    %c0_i32_0 = arith.constant 0 : i32
    %c0_i32_1 = arith.constant 0 : i32
    return %arg0, %c0_i32, %c0_i32_0 : i32, i32, i32
  }
  func.func @transform_2(%arg0: i32) -> (i32, i32, i32, i32) {
    %c0_i32 = arith.constant 0 : i32
    %c0_i32_0 = arith.constant 0 : i32
    %c0_i32_1 = arith.constant 0 : i32
    %c0_i32_2 = arith.constant 0 : i32
    return %arg0, %c0_i32, %c0_i32_0, %c0_i32_1 : i32, i32, i32, i32
  }
  func.func @transform_3(%arg0: i32) -> (i32, i32) {
    %c0_i32 = arith.constant 0 : i32
    %c0_i32_0 = arith.constant 0 : i32
    %c0_i32_1 = arith.constant 0 : i32
    return %c0_i32, %c0_i32_0 : i32, i32
  }
  func.func @transform_4(%arg0: i32) -> (i32, i32) {
    %c0_i32 = arith.constant 0 : i32
    %c0_i32_0 = arith.constant 0 : i32
    %c0_i32_1 = arith.constant 0 : i32
    return %c0_i32, %c0_i32_0 : i32, i32
  }
  func.func @transform_5(%arg0: i32) -> (i32, i32) {
    %c0_i32 = arith.constant 0 : i32
    %c0_i32_0 = arith.constant 0 : i32
    %c0_i32_1 = arith.constant 0 : i32
    return %c0_i32, %c0_i32_0 : i32, i32
  }
  func.func @transform_6(%arg0: i32) -> (i32, i32) {
    %c0_i32 = arith.constant 0 : i32
    %c0_i32_0 = arith.constant 0 : i32
    %c0_i32_1 = arith.constant 0 : i32
    return %c0_i32, %c0_i32_0 : i32, i32
  }
  func.func @transform_7(%arg0: i32) -> (i32, i32) {
    %c0_i32 = arith.constant 0 : i32
    %c0_i32_0 = arith.constant 0 : i32
    %c0_i32_1 = arith.constant 0 : i32
    return %c0_i32, %c0_i32_0 : i32, i32
  }
  func.func @transform_8(%arg0: i32) -> (i32, i32) {
    %c0_i32 = arith.constant 0 : i32
    %c0_i32_0 = arith.constant 0 : i32
    %c0_i32_1 = arith.constant 0 : i32
    return %c0_i32, %c0_i32_0 : i32, i32
  }
  func.func @transform_9(%arg0: i32) -> (i32, i32) {
    %c0_i32 = arith.constant 0 : i32
    %c0_i32_0 = arith.constant 0 : i32
    %c0_i32_1 = arith.constant 0 : i32
    return %c0_i32, %c0_i32_0 : i32, i32
  }
  func.func @transform_10(%arg0: i32) -> (i32, i32) {
    %c0_i32 = arith.constant 0 : i32
    %c0_i32_0 = arith.constant 0 : i32
    %c0_i32_1 = arith.constant 0 : i32
    return %c0_i32, %c0_i32_0 : i32, i32
  }
  func.func @transform_11(%arg0: i32) -> (i32, i32, i32) {
    %c0_i32 = arith.constant 0 : i32
    %c0_i32_0 = arith.constant 0 : i32
    %c0_i32_1 = arith.constant 0 : i32
    %c0_i32_2 = arith.constant 0 : i32
    return %c0_i32, %c0_i32_0, %c0_i32_1 : i32, i32, i32
  }
  func.func @transform_12(%arg0: i32) -> (i32, i32, i32) {
    %c0_i32 = arith.constant 0 : i32
    %c0_i32_0 = arith.constant 0 : i32
    %c0_i32_1 = arith.constant 0 : i32
    %c0_i32_2 = arith.constant 0 : i32
    return %c0_i32, %c0_i32_0, %c0_i32_1 : i32, i32, i32
  }
  func.func @transform_13(%arg0: i32) -> (i32, i32) {
    %c0_i32 = arith.constant 0 : i32
    %c0_i32_0 = arith.constant 0 : i32
    %c0_i32_1 = arith.constant 0 : i32
    return %c0_i32, %c0_i32_0 : i32, i32
  }
  func.func @transform_14(%arg0: i32) -> (i32, i32) {
    %c0_i32 = arith.constant 0 : i32
    %c0_i32_0 = arith.constant 0 : i32
    %c0_i32_1 = arith.constant 0 : i32
    return %c0_i32, %c0_i32_0 : i32, i32
  }
  func.func @transform_15(%arg0: i32) -> (i32, i32, i32) {
    %c0_i32 = arith.constant 0 : i32
    %c0_i32_0 = arith.constant 0 : i32
    %c0_i32_1 = arith.constant 0 : i32
    return %arg0, %c0_i32, %c0_i32_0 : i32, i32, i32
  }
}

</mosaic_0001>

<bundles_post_ra>
// kernel: tpu_custom_call.1
= control target key start
LH: loop header
LB: loop body
LE: loop exit
PB: predicated region body
PF: predicated region fallthrough
CT: control target
= control target key end

     0   :  { %s4544_s0 = inlined_call_operand.vmem [shape: f32[4,64,16], index: 0, kind: input, shape index: {}]   ;;  %s4545_s1 = inlined_call_operand.vmem [shape: f32[4,64,64], index: 1, kind: input, shape index: {}]   ;;  %s4546_s2 = inlined_call_operand.vmem [shape: f32[4,2,64,4], index: 2, kind: input, shape index: {}]   ;;  %s4547_s3 = inlined_call_operand.vmem [shape: bf16[16,32], index: 3, kind: input, shape index: {}]   ;;  %s4548_s4 = inlined_call_operand.vmem [shape: f32[1,32], index: 4, kind: input, shape index: {}]   ;;  %s4549_s5 = inlined_call_operand.vmem [shape: f32[1,32], index: 5, kind: input, shape index: {}]   ;;  %s4550_s6 = inlined_call_operand.vmem [shape: f32[1,32], index: 6, kind: input, shape index: {}]   ;;  %s4551_s7 = inlined_call_operand.vmem [shape: f32[64,32], index: 7, kind: input, shape index: {}]   ;;  %s4552_s8 = inlined_call_operand.vmem [shape: f32[1,32], index: 8, kind: input, shape index: {}]   ;;  %s4553_s9 = inlined_call_operand.vmem [shape: f32[64,4], index: 9, kind: input, shape index: {}]   ;;  %s4554_s10 = inlined_call_operand.vmem [shape: f32[1,4], index: 10, kind: input, shape index: {}]   ;;  %s4555_s11 = inlined_call_operand.vmem [shape: bf16[2,64,32], index: 11, kind: input, shape index: {}]   ;;  %s4556_s12 = inlined_call_operand.vmem [shape: f32[2,1,32], index: 12, kind: input, shape index: {}]   ;;  %s4557_s13 = inlined_call_operand.vmem [shape: bf16[32,8], index: 13, kind: input, shape index: {}]   ;;  %s4558_s14 = inlined_call_operand.vmem [shape: f32[1,8], index: 14, kind: input, shape index: {}]   ;;  %s4559_s15 = inlined_call_operand.hbm [shape: f32[4,1,8], index: 15, kind: output, shape index: {}]  }
   0x1   :  { %4562 = sst [smem:[#allocation6_spill]] %s4544_s0 }
   0x2   :  { %4563 = sst [smem:[#allocation7_spill]] %s4545_s1 }
   0x3   :  { %4564 = sst [smem:[#allocation8_spill]] %s4547_s3 }
   0x4   :  { %4565 = sst [smem:[#allocation9_spill]] %s4548_s4 }
   0x5   :  { %20 = vsyncpa [#allocation3], 0 }
   0x6   :  { %22 = vsyncpa [#allocation3 + $0x1], 0  ;;  %s3322_s18 = smov 0   ;;  %s3324_s19 = smov 0  }
   0x7   :  { %s3326_s20 = smov 0   ;;  %s3328_s21 = smov 0  }
   0x8 LB: > { %s3343_s22 = sadd.s32 4294967295, %s3233_s21   ;;  %s2722_s23 = sadd.s32 4294967294, %s3233_s21   ;;  %s3233_s21 = sphi %s3328_s21, %s4590_s21   ;;  %s3229_s20 = sphi %s3326_s20, %s4589_s20   ;;  %s3225_s19 = sphi %s3324_s19, %s4588_s19   ;;  %s3221_s18 = sphi %s3322_s18, %s4587_s18  }
   0x9   : > { %s3347_s24 = sadd.s32 1, %s3233_s21   ;;  %s365_s25 = sadd.s32 1, %s3229_s20 }
   0xa   : > { %s362_s26 = ssub.s32 %s3233_s21, %s3347_s24  ;;  %p375_p0 = scmp.ne.s32.totalorder %s3229_s20, %s3225_s19 }
   0xb   : > { %p363_p1 = scmp.eq.s32.totalorder %s362_s26, 0  ;;  %p376_p2 = scmp.eq.s32.totalorder %s3343_s22, 3 }
   0xc   : > { %p381_p3 = scmp.ne.s32.totalorder %s3225_s19, %s3221_s18  ;;  %p382_p4 = scmp.eq.s32.totalorder %s2722_s23, 3 }
   0xd   : > { %s3358_s27 = scalar_select %p363_p1, %s3229_s20, %s365_s25  }
   0xe   : > { %p3360_p5 = por %p376_p2, %p375_p0  ;;  %p3364_p6 = por %p382_p4, %p381_p3 }
   0xf   : > { %4566 = sst [smem:[#allocation5_spill]] %s3358_s27  ;;  %p2725_p7 = scmp.ge.s32.totalorder %s3233_s21, 1 }
  0x10   : > { %p460_p8 = scmp.lt.s32.totalorder %s3233_s21, 5 }
  0x12   : > { %p461_p9 = pnand %p2725_p7, %p460_p8 }
  0x13   : > { %s4569_s3 = sld [smem:[#allocation8_spill]] (!%p461_p9)  ;;  %p517_p10 = scmp.lt.s32.totalorder (!%p461_p9), %s3343_s22, 3 }
  0x14   : > { %464 = sbr.rel (%p461_p9) target bundleno = 4449 (0x1161), region = 80  ;;  %s4570_s0 = sld [smem:[#allocation6_spill]] (!%p461_p9) }
  0x15   : > { %s4571_s4 = sld [smem:[#allocation9_spill]] (!%p461_p9)  ;;  %s4577_s16 = smov (!%p461_p9), 32  }
  0x16   : > { %s4576_s1 = sld [smem:[#allocation7_spill]] (!%p461_p9)  ;;  %s3237_s26 = smov (!%p461_p9), 127  }
  0x19   : > { %v2902_v0 = vld [vmem:[%s4569_s3] sm:$0xff]  ;;  %s3375_s17 = scalar_select %p517_p10, %s3343_s22, 3  ;;  %vm571_vm0 = vcmask 130048   ;;  %vm639_vm1 = vcmask 261120   ;;  %v3235_v46 = vmov 32.0  }
  0x1a   : > { %2913 = vmatpush.bf16.msra.mxu3 %v2902_v0  ;;  %591 = vmatpush.bf16.msra.mxu0 %v2902_v0  ;;  %3105 = vrcp.f32 %v3235_v46 }
  0x1b   : > { %s2899_s23 = sshll.u32 %s3375_s17, 6  ;;  %v3098_v14 = vld [vmem:[%s4571_s4] ss:$0 sm:$0xff] }
  0x1c   : > { %s521_s27 = scalar_lea.vmem %s4570_s0, %s2899_s23  ;;  %s3581_s25 = scalar_lea.vmem %s4576_s1, %s2899_s23 }
  0x1d   : > { %v535_v1 = vld [vmem:[%s521_s27 + $0x10] sm:$0xff]  ;;  %v536_v2 = vld [vmem:[%s521_s27 + $0x18] sm:$0xff]  ;;  %v533_v4 = vld [vmem:[%s521_s27] sm:$0xff]  ;;  %s4560_s23 = smov 32   ;;  %s2901_s0 = sshll.u32 %s3375_s17, 7 }
  0x1e   : > { %v556_v3 = vpack.c.bf16 %v536_v2, %v535_v1  ;;  %v534_v5 = vld [vmem:[%s521_s27 + $0x8] sm:$0xff]  ;;  %v537_v7 = vld [vmem:[%s521_s27 + $0x20] sm:$0xff]  ;;  %v539_v10 = vld [vmem:[%s521_s27 + $0x30] sm:$0xff]  ;;  %s515_s17 = sand.u32 1, %s3225_s19  }
  0x1f   : > { %v555_v6 = vpack.c.bf16 %v534_v5, %v533_v4  ;;  %v538_v8 = vld [vmem:[%s521_s27 + $0x28] sm:$0xff]  ;;  %v540_v11 = vld [vmem:[%s521_s27 + $0x38] sm:$0xff]  ;;  %s516_s1 = scalar_lea.vmem [#allocation2], %s515_s17  ;;  %s2631_s4 = scalar_lea.sflag [#allocation3], %s515_s17 }
  0x20   : > { %2737 = vmatmul.msk.bf16.vlgmr.msra.gmra.mxu3 %vm571_vm0, %v556_v3  ;;  %v557_v9 = vpack.c.bf16 %v538_v8, %v537_v7  ;;  %v558_v12 = vpack.c.bf16 %v540_v11, %v539_v10  ;;  %v3106_v47 = vpop.eup %3105  ;;  %s2641_s3 = sshll.u32 %s516_s1, 4  ;;  %s2642_s3 = int_to_ptr.vmem [resolvable:$true] %s2641_s3 }
  0x21   : > { %2736 = vmatmul.msk.bf16.vlgmr.msra.gmra.mxu0 %vm571_vm0, %v555_v6  ;;  %v665_v48 = vmul.f32 32.0, %v3106_v47  ;;  %vm669_vm2 = vweird.f32 %v3106_v47 }
  0x23   : > { %v666_v49 = vsub.f32 1.0, %v665_v48 }
  0x25   : > { %v667_v51 = vmul.f32 %v3106_v47, %v666_v49 }
  0x27   : > { %v668_v52 = vadd.f32 %v3106_v47, %v667_v51 }
  0x29   : > { %v3404_v53 = vsel %vm669_vm2, %v3106_v47, %v668_v52 }
  0x30   : > { %2738 = vmatmul.msk.bf16.gmra.mxu3 %vm571_vm0, %v557_v9 }
  0x40   : > { %2739 = vmatmul.msk.bf16.gmra.mxu3 %vm571_vm0, %v558_v12 }
  0x9e   : > { %v593_v29 = vpop.f32.mrf.mxu0 }
  0x9f   : > { %v3394_v31 = vadd.f32 %v3098_v14, %v593_v29 }
  0xa1   : > { %v613_v33 = vmax.f32 %v3394_v31, 0.0 }
  0xa3   : > { %v598_v13 = vpop.f32.mrf.mxu3  ;;  %v640_v37 = vsel %vm639_vm1, %v613_v33, 0.0 }
  0xa4   : > { %v599_v18 = vadd.f32 %v3098_v14, %v598_v13 }
  0xa6   : > { %v615_v21 = vmax.f32 %v599_v18, 0.0  ;;  %v595_v41 = vpop.f32.mrf.mxu0 }
  0xa7   : > { %v596_v43 = vadd.f32 %v3098_v14, %v595_v41 }
  0xa8   : > { %v646_v22 = vsel %vm639_vm1, %v615_v21, 0.0 }
  0xa9   : > { %v614_v44 = vmax.f32 %v596_v43, 0.0 }
  0xab   : > { %v600_v15 = vpop.f32.mrf.mxu3  ;;  %v643_v45 = vsel %vm639_vm1, %v614_v44, 0.0 }
  0xac   : > { %v3386_v16 = vadd.f32 %v3098_v14, %v600_v15 }
  0xae   : > { %v616_v17 = vmax.f32 %v3386_v16, 0.0 }
  0xb0   : > { %v649_v19 = vsel %vm639_vm1, %v616_v17, 0.0 }
  0xb1   : > { %650 = vadd.xlane.f32.xlu2 %v649_v19 }
  0xb3   : > { %v603_v20 = vpop.f32.mrf.mxu3 }
  0xb4   : > { %v604_v26 = vadd.f32 %v3098_v14, %v603_v20 }
  0xb6   : > { %v617_v30 = vmax.f32 %v604_v26, 0.0 }
  0xb8   : > { %v652_v32 = vsel %vm639_vm1, %v617_v30, 0.0 }
  0xb9   : > { %647 = vadd.xlane.f32.xlu2 %v646_v22 }
  0xbb   : > { %v605_v23 = vpop.f32.mrf.mxu3 }
  0xbc   : > { %v606_v24 = vadd.f32 %v3098_v14, %v605_v23 }
  0xbe   : > { %v618_v25 = vmax.f32 %v606_v24, 0.0 }
  0xc0   : > { %v655_v27 = vsel %vm639_vm1, %v618_v25, 0.0 }
  0xc1   : > { %656 = vadd.xlane.f32.xlu1 %v655_v27 }
  0xc3   : > { %v608_v28 = vpop.f32.mrf.mxu3 }
  0xc4   : > { %v609_v38 = vadd.f32 %v3098_v14, %v608_v28 }
  0xc6   : > { %v619_v40 = vmax.f32 %v609_v38, 0.0 }
  0xc8   : > { %v658_v42 = vsel %vm639_vm1, %v619_v40, 0.0 }
  0xc9   : > { %653 = vadd.xlane.f32.xlu1 %v652_v32 }
  0xcb   : > { %v610_v34 = vpop.f32.mrf.mxu3 }
  0xcc   : > { %v611_v35 = vadd.f32 %v3098_v14, %v610_v34 }
  0xce   : > { %v620_v36 = vmax.f32 %v611_v35, 0.0 }
  0xd0   : > { %v661_v39 = vsel %vm639_vm1, %v620_v36, 0.0 }
  0xd1   : > { %662 = vadd.xlane.f32.xlu0 %v661_v39  ;;  %641 = vadd.xlane.f32.xlu1 %v640_v37 }
  0xd9   : > { %659 = vadd.xlane.f32.xlu0 %v658_v42 }
  0xe1   : > { %644 = vadd.xlane.f32.xlu0 %v643_v45 }
 0x124   : > { %v651_v50 = vpop.xlane.xlu2 %650 }
 0x125   : > { %v674_v10 = vmul.f32 %v3404_v53, %v651_v50 }
 0x127   : > { %v3437_v14 = vsub.f32 %v616_v17, %v674_v10 }
 0x129   : > { %v690_v24 = vmul.f32 %v3437_v14, %v3437_v14 }
 0x12c   : > { %v648_v54 = vpop.xlane.xlu2 %647 }
 0x12d   : > { %v673_v57 = vmul.f32 %v3404_v53, %v648_v54 }
 0x12f   : > { %v3412_v60 = vsub.f32 %v615_v21, %v673_v57 }
 0x131   : > { %v689_v62 = vmul.f32 %v3412_v60, %v3412_v60 }
 0x133   : > { %v701_v63 = vsel %vm639_vm1, %v689_v62, 0.0 }
 0x134   : > { %v657_v55 = vpop.xlane.xlu1 %656 }
 0x135   : > { %v676_v56 = vmul.f32 %v3404_v53, %v657_v55 }
 0x137   : > { %v3408_v58 = vsub.f32 %v618_v25, %v676_v56  ;;  %v704_v25 = vsel %vm639_vm1, %v690_v24, 0.0  ;;  %v3502_v24 = vld [vmem:[%s4550_s6] ss:$0 sm:$0xff] }
 0x139   : > { %v692_v59 = vmul.f32 %v3408_v58, %v3408_v58 }
 0x13b   : > { %v710_v61 = vsel %vm639_vm1, %v692_v59, 0.0 }
 0x13c   : > { %711 = vadd.xlane.f32.xlu1 %v710_v61  ;;  %v654_v0 = vpop.xlane.xlu1 %653 }
 0x13d   : > { %v675_v3 = vmul.f32 %v3404_v53, %v654_v0 }
 0x13f   : > { %v3424_v6 = vsub.f32 %v617_v30, %v675_v3 }
 0x141   : > { %v691_v12 = vmul.f32 %v3424_v6, %v3424_v6 }
 0x143   : > { %v707_v15 = vsel %vm639_vm1, %v691_v12, 0.0 }
 0x144   : > { %v663_v1 = vpop.xlane.xlu0 %662  ;;  %702 = vadd.xlane.f32.xlu1 %v701_v63  ;;  %v642_v19 = vpop.xlane.xlu1 %641 }
 0x145   : > { %v678_v2 = vmul.f32 %v3404_v53, %v663_v1  ;;  %v671_v22 = vmul.f32 %v3404_v53, %v642_v19 }
 0x147   : > { %v3420_v4 = vsub.f32 %v620_v36, %v678_v2  ;;  %v3451_v17 = vsub.f32 %v613_v33, %v671_v22 }
 0x149   : > { %v694_v5 = vmul.f32 %v3420_v4, %v3420_v4  ;;  %v687_v27 = vmul.f32 %v3451_v17, %v3451_v17 }
 0x14b   : > { %v716_v7 = vsel %vm639_vm1, %v694_v5, 0.0  ;;  %v695_v28 = vsel %vm639_vm1, %v687_v27, 0.0 }
 0x14c   : > { %v660_v8 = vpop.xlane.xlu0 %659  ;;  %717 = vadd.xlane.f32.xlu2 %v716_v7 }
 0x14d   : > { %v677_v9 = vmul.f32 %v3404_v53, %v660_v8 }
 0x14f   : > { %v3429_v11 = vsub.f32 %v619_v40, %v677_v9 }
 0x151   : > { %v693_v13 = vmul.f32 %v3429_v11, %v3429_v11 }
 0x153   : > { %v713_v18 = vsel %vm639_vm1, %v693_v13, 0.0 }
 0x154   : > { %708 = vadd.xlane.f32.xlu2 %v707_v15  ;;  %714 = vadd.xlane.f32.xlu0 %v713_v18  ;;  %v645_v20 = vpop.xlane.xlu0 %644  ;;  %v3492_v15 = vld [vmem:[%s4549_s5] ss:$0 sm:$0xff] }
 0x155   : > { %v672_v21 = vmul.f32 %v3404_v53, %v645_v20  ;;  %v3590_v20 = vld [vmem:[%s3581_s25] sm:$0xff] }
 0x157   : > { %v3443_v23 = vsub.f32 %v614_v44, %v672_v21 }
 0x159   : > { %v688_v16 = vmul.f32 %v3443_v23, %v3443_v23 }
 0x15b   : > { %v698_v26 = vsel %vm639_vm1, %v688_v16, 0.0 }
 0x15c   : > { %705 = vadd.xlane.f32.xlu0 %v704_v25  ;;  %699 = vadd.xlane.f32.xlu2 %v698_v26 }
 0x164   : > { %696 = vadd.xlane.f32.xlu0 %v695_v28 }
 0x1af   : > { %v712_v29 = vpop.xlane.xlu1 %711 }
 0x1b0   : > { %v724_v30 = vmul.f32 %v712_v29, %v3404_v53 }
 0x1b2   : > { %v732_v32 = vadd.f32 1e-05, %v724_v30 }
 0x1b4   : > { %3107 = vrsqrt.f32 %v732_v32  ;;  %vm791_vm7 = vweird.f32 %v732_v32 }
 0x1b7   : > { %v703_v34 = vpop.xlane.xlu1 %702 }
 0x1b8   : > { %v721_v31 = vmul.f32 %v703_v34, %v3404_v53 }
 0x1ba   : > { %v3460_v33 = vadd.f32 1e-05, %v721_v31  ;;  %v3463_v37 = vpop.eup %3107 }
 0x1bb   : > { %v786_v39 = vmul.f32 %v3463_v37, %v732_v32  ;;  %vm792_vm5 = vweird.f32 %v3463_v37 }
 0x1bc   : > { %3109 = vrsqrt.f32 %v3460_v33  ;;  %vm3495_vm8 = vmor %vm791_vm7, %vm792_vm5  ;;  %vm761_vm0 = vweird.f32 %v3460_v33 }
 0x1bd   : > { %v787_v42 = vmul.f32 %v3463_v37, %v786_v39 }
 0x1bf   : > { %v718_v35 = vpop.xlane.xlu2 %717  ;;  %v788_v50 = vmul.f32 0.5, %v787_v42 }
 0x1c0   : > { %v726_v36 = vmul.f32 %v718_v35, %v3404_v53 }
 0x1c1   : > { %v789_v57 = vsub.f32 1.5, %v788_v50 }
 0x1c2   : > { %v734_v38 = vadd.f32 1e-05, %v726_v36  ;;  %v3470_v45 = vpop.eup %3109 }
 0x1c3   : > { %v756_v51 = vmul.f32 %v3470_v45, %v3460_v33  ;;  %v790_v8 = vmul.f32 %v3463_v37, %v789_v57  ;;  %vm762_vm15 = vweird.f32 %v3470_v45 }
 0x1c4   : > { %3111 = vrsqrt.f32 %v734_v38  ;;  %vm811_vm4 = vweird.f32 %v734_v38  ;;  %vm3528_vm2 = vmor %vm761_vm0, %vm762_vm15 }
 0x1c5   : > { %v757_v62 = vmul.f32 %v3470_v45, %v756_v51  ;;  %v794_v16 = vsel %vm3495_vm8, %v3463_v37, %v790_v8 }
 0x1c6   : > { %v820_v35 = vmul.f32 %v794_v16, %v3408_v58  ;;  %v3615_v16 = vld [vmem:[%s3581_s25 + $0x30] sm:$0xff] }
 0x1c7   : > { %v709_v40 = vpop.xlane.xlu2 %708  ;;  %v715_v41 = vpop.xlane.xlu0 %714  ;;  %v758_v10 = vmul.f32 0.5, %v757_v62 }
 0x1c8   : > { %v723_v43 = vmul.f32 %v709_v40, %v3404_v53  ;;  %v725_v44 = vmul.f32 %v715_v41, %v3404_v53 }
 0x1c9   : > { %v759_v27 = vsub.f32 1.5, %v758_v10 }
 0x1ca   : > { %v3112_v46 = vpop.eup %3111  ;;  %v731_v47 = vadd.f32 1e-05, %v723_v43  ;;  %v3472_v48 = vadd.f32 1e-05, %v725_v44 }
 0x1cb   : > { %v806_v49 = vmul.f32 %v3112_v46, %v734_v38  ;;  %vm812_vm3 = vweird.f32 %v3112_v46  ;;  %v760_v41 = vmul.f32 %v3470_v45, %v759_v27 }
 0x1cc   : > { %3113 = vrsqrt.f32 %v731_v47  ;;  %vm813_vm6 = vmor %vm811_vm4, %vm812_vm3  ;;  %vm781_vm11 = vweird.f32 %v731_v47  ;;  %vm801_vm13 = vweird.f32 %v3472_v48 }
 0x1cd   : > { %v807_v52 = vmul.f32 %v3112_v46, %v806_v49  ;;  %3115 = vrsqrt.f32 %v3472_v48 }
 0x1cf   : > { %v808_v54 = vmul.f32 0.5, %v807_v52  ;;  %v700_v55 = vpop.xlane.xlu2 %699  ;;  %v706_v56 = vpop.xlane.xlu0 %705 }
 0x1d0   : > { %v720_v59 = vmul.f32 %v700_v55, %v3404_v53  ;;  %v722_v61 = vmul.f32 %v706_v56, %v3404_v53 }
 0x1d1   : > { %v809_v63 = vsub.f32 1.5, %v808_v54 }
 0x1d2   : > { %v3114_v0 = vpop.eup %3113  ;;  %v3480_v1 = vadd.f32 1e-05, %v720_v59  ;;  %v3482_v2 = vadd.f32 1e-05, %v722_v61 }
 0x1d3   : > { %v3116_v3 = vpop.eup %3115  ;;  %v810_v5 = vmul.f32 %v3112_v46, %v809_v63  ;;  %v776_v7 = vmul.f32 %v3114_v0, %v731_v47  ;;  %vm782_vm9 = vweird.f32 %v3114_v0 }
 0x1d4   : > { %v796_v9 = vmul.f32 %v3116_v3, %v3472_v48  ;;  %3117 = vrsqrt.f32 %v3480_v1  ;;  %vm802_vm10 = vweird.f32 %v3116_v3  ;;  %vm783_vm12 = vmor %vm781_vm11, %vm782_vm9  ;;  %v831_v48 = vmul.f32 %v3492_v15, %v820_v35 }
 0x1d5   : > { %v814_v12 = vsel %vm813_vm6, %v3112_v46, %v810_v5  ;;  %v777_v13 = vmul.f32 %v3114_v0, %v776_v7  ;;  %3119 = vrsqrt.f32 %v3482_v2  ;;  %vm803_vm14 = vmor %vm801_vm13, %vm802_vm10  ;;  %vm751_vm4 = vweird.f32 %v3480_v1 }
 0x1d6   : > { %v822_v18 = vmul.f32 %v814_v12, %v3420_v4  ;;  %v797_v19 = vmul.f32 %v3116_v3, %v796_v9  ;;  %v3543_v59 = vadd.f32 %v3502_v24, %v831_v48  ;;  %vm771_vm7 = vweird.f32 %v3482_v2 }
 0x1d7   : > { %v778_v21 = vmul.f32 0.5, %v777_v13  ;;  %v697_v22 = vpop.xlane.xlu0 %696 }
 0x1d8   : > { %v833_v25 = vmul.f32 %v3492_v15, %v822_v18  ;;  %v798_v26 = vmul.f32 0.5, %v797_v19  ;;  %v719_v4 = vmul.f32 %v697_v22, %v3404_v53  ;;  %v3605_v22 = vld [vmem:[%s3581_s25 + $0x28] sm:$0xff] }
 0x1d9   : > { %v779_v28 = vsub.f32 1.5, %v778_v21  ;;  %v3593_v21 = vld [vmem:[%s3581_s25 + $0x20] sm:$0xff] }
 0x1da   : > { %v3118_v29 = vpop.eup %3117  ;;  %v3510_v30 = vadd.f32 %v3502_v24, %v833_v25  ;;  %v799_v32 = vsub.f32 1.5, %v798_v26  ;;  %v3512_v34 = vadd.f32 1e-05, %v719_v4  ;;  %v3622_v25 = vld [vmem:[%s3581_s25 + $0x18] sm:$0xff] }
 0x1db   : > { %v3120_v31 = vpop.eup %3119  ;;  %v780_v36 = vmul.f32 %v3114_v0, %v779_v28  ;;  %v746_v37 = vmul.f32 %v3118_v29, %v3480_v1  ;;  %vm752_vm3 = vweird.f32 %v3118_v29  ;;  %v3625_v26 = vld [vmem:[%s3581_s25 + $0x38] sm:$0xff] }
 0x1dc   : > { %v800_v38 = vmul.f32 %v3116_v3, %v799_v32  ;;  %v766_v39 = vmul.f32 %v3120_v31, %v3482_v2  ;;  %3121 = vrsqrt.f32 %v3512_v34  ;;  %878 = vmatpush.msra.mxu1 %v3510_v30  ;;  %2914 = vmatpush.msra.mxu2 %v3510_v30  ;;  %vm772_vm5 = vweird.f32 %v3120_v31  ;;  %vm753_vm6 = vmor %vm751_vm4, %vm752_vm3 }
 0x1dd   : > { %v784_v40 = vsel %vm783_vm12, %v3114_v0, %v780_v36  ;;  %v747_v58 = vmul.f32 %v3118_v29, %v746_v37  ;;  %vm773_vm8 = vmor %vm771_vm7, %vm772_vm5  ;;  %vm741_vm10 = vweird.f32 %v3512_v34  ;;  %vm845_vm12 = vcmask 523264   ;;  %v3642_v36 = vld [vmem:[%s4551_s7 + $0x38] sm:$0xff]  ;;  %v3647_v37 = vld [vmem:[%s4551_s7 + $0x30] sm:$0xff] }
 0x1de   : > { %v804_v42 = vsel %vm803_vm14, %v3116_v3, %v800_v38  ;;  %v767_v43 = vmul.f32 %v3120_v31, %v766_v39  ;;  %v819_v44 = vmul.f32 %v784_v40, %v3424_v6  ;;  %v764_v6 = vsel %vm3528_vm2, %v3470_v45, %v760_v41  ;;  %v3653_v38 = vld [vmem:[%s4551_s7 + $0x28] sm:$0xff]  ;;  %v3659_v39 = vld [vmem:[%s4551_s7 + $0x20] sm:$0xff]  ;;  %v3665_v40 = vld [vmem:[%s4551_s7 + $0x18] sm:$0xff] }
 0x1df   : > { %v821_v46 = vmul.f32 %v804_v42, %v3429_v11  ;;  %v748_v47 = vmul.f32 0.5, %v747_v58  ;;  %v817_v45 = vmul.f32 %v764_v6, %v3412_v60  ;;  %v3671_v58 = vld [vmem:[%s4551_s7 + $0x10] sm:$0xff]  ;;  %v3677_v41 = vld [vmem:[%s4551_s7 + $0x8] sm:$0xff]  ;;  %v3684_v42 = vld [vmem:[%s4551_s7] sm:$0xff] }
 0x1e0   : > { %v768_v49 = vmul.f32 0.5, %v767_v43  ;;  %v830_v33 = vmul.f32 %v3492_v15, %v819_v44 }
 0x1e1   : > { %v832_v51 = vmul.f32 %v3492_v15, %v821_v46  ;;  %v749_v52 = vsub.f32 1.5, %v748_v47  ;;  %v828_v60 = vmul.f32 %v3492_v15, %v817_v45 }
 0x1e2   : > { %v3122_v54 = vpop.eup %3121  ;;  %v769_v11 = vsub.f32 1.5, %v768_v49  ;;  %v3550_v1 = vadd.f32 %v3502_v24, %v830_v33 }
 0x1e3   : > { %v3539_v55 = vadd.f32 %v3502_v24, %v832_v51  ;;  %v750_v56 = vmul.f32 %v3118_v29, %v749_v52  ;;  %v736_v57 = vmul.f32 %v3122_v54, %v3512_v34  ;;  %vm742_vm9 = vweird.f32 %v3122_v54 }
 0x1e4   : > { %v770_v61 = vmul.f32 %v3120_v31, %v769_v11  ;;  %vm743_vm11 = vmor %vm741_vm10, %vm742_vm9  ;;  %v3566_v10 = vadd.f32 %v3502_v24, %v828_v60  ;;  %v3101_v60 = vld [vmem:[%s4552_s8] ss:$0 sm:$0xff] }
 0x1e5   : > { %v754_v62 = vsel %vm753_vm6, %v3118_v29, %v750_v56  ;;  %v737_v63 = vmul.f32 %v3122_v54, %v736_v57  ;;  %879 = vmatpush.msra.mxu1 %v3539_v55  ;;  %2915 = vmatpush.msra.mxu2 %v3539_v55 }
 0x1e6   : > { %v774_v0 = vsel %vm773_vm8, %v3120_v31, %v770_v61  ;;  %v816_v3 = vmul.f32 %v754_v62, %v3443_v23 }
 0x1e7   : > { %v818_v5 = vmul.f32 %v774_v0, %v3437_v14  ;;  %v738_v7 = vmul.f32 0.5, %v737_v63  ;;  %880 = vmatpush.msra.mxu1 %v3543_v59  ;;  %2916 = vmatpush.msra.mxu2 %v3543_v59 }
 0x1e8   : > { %v827_v23 = vmul.f32 %v3492_v15, %v816_v3 }
 0x1e9   : > { %v829_v2 = vmul.f32 %v3492_v15, %v818_v5  ;;  %v739_v8 = vsub.f32 1.5, %v738_v7  ;;  %881 = vmatpush.msra.mxu1 %v3550_v1  ;;  %2917 = vmatpush.msra.mxu2 %v3550_v1 }
 0x1ea   : > { %v3572_v18 = vadd.f32 %v3502_v24, %v827_v23 }
 0x1eb   : > { %v3562_v14 = vadd.f32 %v3502_v24, %v829_v2  ;;  %v740_v9 = vmul.f32 %v3122_v54, %v739_v8 }
 0x1ed   : > { %v744_v12 = vsel %vm743_vm11, %v3122_v54, %v740_v9  ;;  %882 = vmatpush.msra.mxu1 %v3562_v14  ;;  %2918 = vmatpush.msra.mxu2 %v3562_v14 }
 0x1ee   : > { %v815_v13 = vmul.f32 %v744_v12, %v3451_v17 }
 0x1ef   : > { %883 = vmatpush.msra.mxu1 %v3566_v10  ;;  %2919 = vmatpush.msra.mxu2 %v3566_v10 }
 0x1f0   : > { %v826_v17 = vmul.f32 %v3492_v15, %v815_v13  ;;  %v3602_v15 = vld [vmem:[%s3581_s25 + $0x8] sm:$0xff] }
 0x1f1   : > { %884 = vmatpush.msra.mxu1 %v3572_v18  ;;  %2920 = vmatpush.msra.mxu2 %v3572_v18 }
 0x1f2   : > { %v3587_v19 = vadd.f32 %v3502_v24, %v826_v17  ;;  %v3612_v24 = vld [vmem:[%s3581_s25 + $0x10] sm:$0xff] }
 0x1f4   : > { %885 = vmatpush.msra.mxu1 %v3587_v19  ;;  %2921 = vmatpush.msra.mxu2 %v3587_v19 }
 0x1f5   : > { %2740 = vmatmul.msk.f32.vlgmr.msra.gmra.mxu1 %vm845_vm12, %v3590_v20  ;;  %2744 = vmatmul.msk.f32.vlgmr.msra.gmra.mxu2 %vm845_vm12, %v3593_v21 }
 0x1f6   : > { %986 = vmatpush.msrb.mxu2 %v3642_v36 }
 0x1f8   : > { %987 = vmatpush.msrb.mxu2 %v3647_v37 }
 0x1fa   : > { %988 = vmatpush.msrb.mxu2 %v3653_v38 }
 0x1fc   : > { %989 = vmatpush.msrb.mxu2 %v3659_v39 }
 0x1fd   : > { %2741 = vmatmul.msk.f32.gmra.mxu1 %vm845_vm12, %v3602_v15  ;;  %2745 = vmatmul.msk.f32.gmra.mxu2 %vm845_vm12, %v3605_v22 }
 0x1fe   : > { %990 = vmatpush.msrb.mxu2 %v3665_v40 }
 0x200   : > { %991 = vmatpush.msrb.mxu2 %v3671_v58 }
 0x202   : > { %992 = vmatpush.msrb.mxu2 %v3677_v41 }
 0x204   : > { %993 = vmatpush.msrb.mxu2 %v3684_v42 }
 0x205   : > { %2742 = vmatmul.msk.f32.gmra.mxu1 %vm845_vm12, %v3612_v24  ;;  %2746 = vmatmul.msk.f32.gmra.mxu2 %vm845_vm12, %v3615_v16 }
 0x20d   : > { %2743 = vmatmul.msk.f32.gmra.mxu1 %vm845_vm12, %v3622_v25  ;;  %2747 = vmatmul.msk.f32.gmra.mxu2 %vm845_vm12, %v3625_v26 }
 0x272   : > { %v887_v4 = vpop.f32.mrf.mxu1 }
 0x273   : > { %919 = vrot.lane.b32.xlu1 %v887_v4, %s4560_s23 }
 0x278   : > { %v899_v27 = vpop.f32.mrf.mxu2 }
 0x27a   : > { %v890_v28 = vpop.f32.mrf.mxu1 }
 0x27b   : > { %927 = vrot.lane.b32.xlu1 %v899_v27, %s4560_s23  ;;  %921 = vrot.lane.b32.xlu2 %v890_v28, %s4560_s23 }
 0x280   : > { %v902_v29 = vpop.f32.mrf.mxu2 }
 0x282   : > { %v893_v32 = vpop.f32.mrf.mxu1 }
 0x283   : > { %923 = vrot.lane.b32.xlu0 %v893_v32, %s4560_s23 }
 0x288   : > { %v905_v34 = vpop.f32.mrf.mxu2 }
 0x28a   : > { %v896_v31 = vpop.f32.mrf.mxu1 }
 0x28b   : > { %929 = vrot.lane.b32.xlu0 %v902_v29, %s4560_s23  ;;  %925 = vrot.lane.b32.xlu2 %v896_v31, %s4560_s23 }
 0x290   : > { %v908_v35 = vpop.f32.mrf.mxu2 }
 0x291   : > { %933 = vrot.lane.b32.xlu1 %v908_v35, %s4560_s23 }
 0x293   : > { %931 = vrot.lane.b32.xlu2 %v905_v34, %s4560_s23  ;;  %s3859_s23 = scalar_lea.vmem %s4546_s2, %s2901_s0  ;;  %s2639_s0 = scalar_lea.hbm %s4559_s15, %s3343_s22 }
 0x294   : > { %s2643_s27 = sshll.u32 %s2639_s0, 4  ;;  %s2644_s27 = int_to_ptr.hbm [resolvable:$true] %s2643_s27 }
 0x2d5   : > { %v922_v46 = vpop.permute.xlu2 %921 }
 0x2d6   : > { %v944_v47 = vsel %vm639_vm1, %v3572_v18, %v922_v46 }
 0x2e5   : > { %v920_v43 = vpop.permute.xlu1 %919  ;;  %v926_v50 = vpop.permute.xlu2 %925 }
 0x2e6   : > { %v943_v44 = vsel %vm639_vm1, %v3587_v19, %v920_v43  ;;  %v946_v51 = vsel %vm639_vm1, %v3562_v14, %v926_v50 }
 0x2e7   : > { %2748 = vmatmul.msk.f32.vlgmr.msrb.gmra.mxu2 %vm845_vm12, %v943_v44 }
 0x2ed   : > { %v928_v52 = vpop.permute.xlu1 %927  ;;  %v932_v33 = vpop.permute.xlu2 %931 }
 0x2ee   : > { %v947_v54 = vsel %vm639_vm1, %v3550_v1, %v928_v52  ;;  %v949_v56 = vsel %vm639_vm1, %v3539_v55, %v932_v33  ;;  %v3785_v33 = vld [vmem:[%s4553_s9 + $0x28] sm:$0xff] }
 0x2ef   : > { %2749 = vmatmul.msk.f32.gmra.mxu2 %vm845_vm12, %v944_v47 }
 0x2f5   : > { %v924_v48 = vpop.permute.xlu0 %923 }
 0x2f6   : > { %v945_v49 = vsel %vm639_vm1, %v3566_v10, %v924_v48 }
 0x2f7   : > { %2750 = vmatmul.msk.f32.gmra.mxu2 %vm845_vm12, %v945_v49 }
 0x2fd   : > { %v930_v6 = vpop.permute.xlu0 %929 }
 0x2fe   : > { %v948_v11 = vsel %vm639_vm1, %v3543_v59, %v930_v6  ;;  %v3774_v6 = vld [vmem:[%s4553_s9 + $0x38] sm:$0xff] }
 0x2ff   : > { %2751 = vmatmul.msk.f32.gmra.mxu2 %vm845_vm12, %v946_v51  ;;  %1143 = vmatpush.msrb.mxu0 %v3774_v6 }
 0x303   : > { %v934_v57 = vpop.permute.xlu1 %933 }
 0x304   : > { %v950_v61 = vsel %vm639_vm1, %v3510_v30, %v934_v57  ;;  %v3797_v57 = vld [vmem:[%s4553_s9 + $0x18] sm:$0xff] }
 0x307   : > { %2752 = vmatmul.msk.f32.gmra.mxu2 %vm845_vm12, %v947_v54 }
 0x30f   : > { %2753 = vmatmul.msk.f32.gmra.mxu2 %vm845_vm12, %v948_v11  ;;  %v3779_v11 = vld [vmem:[%s4553_s9 + $0x30] sm:$0xff] }
 0x310   : > { %1144 = vmatpush.msrb.mxu0 %v3779_v11 }
 0x312   : > { %1145 = vmatpush.msrb.mxu0 %v3785_v33 }
 0x317   : > { %2754 = vmatmul.msk.f32.gmra.mxu2 %vm845_vm12, %v949_v56  ;;  %v3791_v56 = vld [vmem:[%s4553_s9 + $0x20] sm:$0xff] }
 0x318   : > { %1146 = vmatpush.msrb.mxu0 %v3791_v56 }
 0x31a   : > { %1147 = vmatpush.msrb.mxu0 %v3797_v57 }
 0x31f   : > { %2755 = vmatmul.msk.f32.gmra.mxu2 %vm845_vm12, %v950_v61  ;;  %v3803_v61 = vld [vmem:[%s4553_s9 + $0x10] sm:$0xff] }
 0x320   : > { %1148 = vmatpush.msrb.mxu0 %v3803_v61 }
 0x36a   : > { %v995_v45 = vpop.f32.mrf.mxu2 }
 0x36b   : > { %v996_v31 = vadd.f32 %v3101_v60, %v995_v45  ;;  %v3809_v45 = vld [vmem:[%s4553_s9 + $0x8] sm:$0xff] }
 0x36c   : > { %1149 = vmatpush.msrb.mxu0 %v3809_v45 }
 0x36d   : > { %v1019_v44 = vmax.f32 %v996_v31, 0.0 }
 0x372   : > { %v998_v62 = vpop.f32.mrf.mxu2 }
 0x373   : > { %v3736_v32 = vadd.f32 %v3101_v60, %v998_v62  ;;  %v3816_v62 = vld [vmem:[%s4553_s9] sm:$0xff] }
 0x374   : > { %1150 = vmatpush.msrb.mxu0 %v3816_v62 }
 0x375   : > { %v1020_v43 = vmax.f32 %v3736_v32, 0.0 }
 0x376   : > { %1823 = vmatpush.msra.mxu0 %v3642_v36 }
 0x378   : > { %1824 = vmatpush.msra.mxu0 %v3647_v37 }
 0x37a   : > { %v1001_v63 = vpop.f32.mrf.mxu2  ;;  %1825 = vmatpush.msra.mxu0 %v3653_v38 }
 0x37b   : > { %v3731_v28 = vadd.f32 %v3101_v60, %v1001_v63 }
 0x37c   : > { %1826 = vmatpush.msra.mxu0 %v3659_v39 }
 0x37d   : > { %v1021_v35 = vmax.f32 %v3731_v28, 0.0 }
 0x37e   : > { %1827 = vmatpush.msra.mxu0 %v3665_v40 }
 0x380   : > { %1828 = vmatpush.msra.mxu0 %v3671_v58 }
 0x382   : > { %v1004_v0 = vpop.f32.mrf.mxu2  ;;  %1829 = vmatpush.msra.mxu0 %v3677_v41 }
 0x383   : > { %v3726_v4 = vadd.f32 %v3101_v60, %v1004_v0 }
 0x384   : > { %1830 = vmatpush.msra.mxu0 %v3684_v42 }
 0x385   : > { %v1022_v34 = vmax.f32 %v3726_v4, 0.0 }
 0x38a   : > { %v1007_v3 = vpop.f32.mrf.mxu2 }
 0x38b   : > { %v3721_v13 = vadd.f32 %v3101_v60, %v1007_v3 }
 0x38d   : > { %v1023_v29 = vmax.f32 %v3721_v13, 0.0 }
 0x392   : > { %v1010_v5 = vpop.f32.mrf.mxu2 }
 0x393   : > { %v3718_v9 = vadd.f32 %v3101_v60, %v1010_v5 }
 0x395   : > { %v1024_v27 = vmax.f32 %v3718_v9, 0.0 }
 0x39a   : > { %v1013_v7 = vpop.f32.mrf.mxu2 }
 0x39b   : > { %v3714_v8 = vadd.f32 %v3101_v60, %v1013_v7 }
 0x39d   : > { %v1025_v17 = vmax.f32 %v3714_v8, 0.0  ;;  %v3102_v8 = vld [vmem:[%s4554_s10] ss:$0 sm:$0xff] }
 0x3a2   : > { %v1016_v2 = vpop.f32.mrf.mxu2 }
 0x3a3   : > { %v3716_v23 = vadd.f32 %v3101_v60, %v1016_v2 }
 0x3a5   : > { %v1026_v12 = vmax.f32 %v3716_v23, 0.0 }
 0x3a7   : > { %1035 = vmatpush.msrb.mxu3 %v1026_v12 }
 0x3a9   : > { %1036 = vmatpush.msrb.mxu3 %v1025_v17 }
 0x3ab   : > { %1037 = vmatpush.msrb.mxu3 %v1024_v27 }
 0x3ad   : > { %1038 = vmatpush.msrb.mxu3 %v1023_v29 }
 0x3af   : > { %1039 = vmatpush.msrb.mxu3 %v1022_v34 }
 0x3b1   : > { %1040 = vmatpush.msrb.mxu3 %v1021_v35 }
 0x3b3   : > { %1041 = vmatpush.msrb.mxu3 %v1020_v43 }
 0x3b5   : > { %1042 = vmatpush.msrb.mxu3 %v1019_v44 }
 0x3b6   : > { %2756 = vmatmul.msk.f32.vlgmr.msrb.gmra.mxu3 %vm845_vm12, %v3590_v20 }
 0x3be   : > { %2757 = vmatmul.msk.f32.gmra.mxu3 %vm845_vm12, %v3602_v15 }
 0x3c6   : > { %2758 = vmatmul.msk.f32.gmra.mxu3 %vm845_vm12, %v3612_v24 }
 0x3ce   : > { %2759 = vmatmul.msk.f32.gmra.mxu3 %vm845_vm12, %v3622_v25 }
 0x3d6   : > { %2760 = vmatmul.msk.f32.gmra.mxu3 %vm845_vm12, %v3593_v21 }
 0x3de   : > { %2761 = vmatmul.msk.f32.gmra.mxu3 %vm845_vm12, %v3605_v22 }
 0x3e6   : > { %2762 = vmatmul.msk.f32.gmra.mxu3 %vm845_vm12, %v3615_v16 }
 0x3ee   : > { %2763 = vmatmul.msk.f32.gmra.mxu3 %vm845_vm12, %v3625_v26 }
 0x439   : > { %v1044_v46 = vpop.f32.mrf.mxu3 }
 0x43a   : > { %1076 = vrot.lane.b32.xlu0 %v1044_v46, %s4577_s16 }
 0x441   : > { %v1047_v47 = vpop.f32.mrf.mxu3 }
 0x442   : > { %1078 = vrot.lane.b32.xlu2 %v1047_v47, %s4577_s16 }
 0x449   : > { %v1050_v48 = vpop.f32.mrf.mxu3 }
 0x44a   : > { %1080 = vrot.lane.b32.xlu1 %v1050_v48, %s4577_s16 }
 0x451   : > { %v1053_v49 = vpop.f32.mrf.mxu3 }
 0x452   : > { %1082 = vrot.lane.b32.xlu0 %v1053_v49, %s4577_s16  ;;  %v1181_v49 = vld [vmem:[%s3859_s23 + $0x28] sm:$0xff] }
 0x459   : > { %v1056_v50 = vpop.f32.mrf.mxu3 }
 0x45a   : > { %1084 = vrot.lane.b32.xlu2 %v1056_v50, %s4577_s16 }
 0x461   : > { %v1059_v51 = vpop.f32.mrf.mxu3 }
 0x462   : > { %1086 = vrot.lane.b32.xlu1 %v1059_v51, %s4577_s16  ;;  %v1183_v51 = vld [vmem:[%s3859_s23 + $0x38] sm:$0xff] }
 0x469   : > { %v1062_v52 = vpop.f32.mrf.mxu3 }
 0x46a   : > { %1088 = vrot.lane.b32.xlu0 %v1062_v52, %s4577_s16 }
 0x471   : > { %v1065_v54 = vpop.f32.mrf.mxu3 }
 0x472   : > { %1090 = vrot.lane.b32.xlu2 %v1065_v54, %s4577_s16 }
 0x49c   : > { %v1079_v36 = vpop.permute.xlu2 %1078 }
 0x49d   : > { %v1101_v37 = vsel %vm639_vm1, %v1020_v43, %v1079_v36 }
 0x4ac   : > { %v1077_v63 = vpop.permute.xlu0 %1076 }
 0x4ad   : > { %v1100_v0 = vsel %vm639_vm1, %v1019_v44, %v1077_v63  ;;  %v1182_v44 = vld [vmem:[%s3859_s23 + $0x30] sm:$0xff] }
 0x4ae   : > { %2764 = vmatmul.msk.f32.vlgmr.msrb.gmra.mxu0 %vm845_vm12, %v1100_v0 }
 0x4b4   : > { %v1085_v41 = vpop.permute.xlu2 %1084 }
 0x4b5   : > { %v1104_v42 = vsel %vm639_vm1, %v1023_v29, %v1085_v41  ;;  %v1177_v41 = vld [vmem:[%s3859_s23 + $0x8] sm:$0xff] }
 0x4b6   : > { %2765 = vmatmul.msk.f32.gmra.mxu0 %vm845_vm12, %v1101_v37  ;;  %v1176_v37 = vld [vmem:[%s3859_s23] sm:$0xff] }
 0x4bc   : > { %v1081_v38 = vpop.permute.xlu1 %1080 }
 0x4bd   : > { %v1102_v39 = vsel %vm639_vm1, %v1021_v35, %v1081_v38  ;;  %v1178_v38 = vld [vmem:[%s3859_s23 + $0x10] sm:$0xff] }
 0x4be   : > { %2766 = vmatmul.msk.f32.gmra.mxu0 %vm845_vm12, %v1102_v39 }
 0x4c4   : > { %v1083_v40 = vpop.permute.xlu0 %1082 }
 0x4c5   : > { %v1103_v58 = vsel %vm639_vm1, %v1022_v34, %v1083_v40  ;;  %v1179_v34 = vld [vmem:[%s3859_s23 + $0x18] sm:$0xff] }
 0x4c6   : > { %2767 = vmatmul.msk.f32.gmra.mxu0 %vm845_vm12, %v1103_v58 }
 0x4cc   : > { %v1091_v2 = vpop.permute.xlu2 %1090 }
 0x4cd   : > { %v1107_v13 = vsel %vm639_vm1, %v1026_v12, %v1091_v2  ;;  %v1180_v12 = vld [vmem:[%s3859_s23 + $0x20] sm:$0xff] }
 0x4ce   : > { %2768 = vmatmul.msk.f32.gmra.mxu0 %vm845_vm12, %v1104_v42 }
 0x4d4   : > { %v1087_v3 = vpop.permute.xlu1 %1086 }
 0x4d5   : > { %v1105_v5 = vsel %vm639_vm1, %v1024_v27, %v1087_v3  ;;  %v3238_v3 = vmov 2  }
 0x4d6   : > { %2769 = vmatmul.msk.f32.gmra.mxu0 %vm845_vm12, %v1105_v5  ;;  %2974 = vset.pattern.permute.xlu1 %v3238_v3 }
 0x4d7   : > { %2968 = vset.pattern.permute.xlu2 %v3238_v3  ;;  %2980 = vset.pattern.permute.xlu0 %v3238_v3 }
 0x4dc   : > { %v1089_v7 = vpop.permute.xlu0 %1088 }
 0x4dd   : > { %v1106_v60 = vsel %vm639_vm1, %v1025_v17, %v1089_v7 }
 0x4de   : > { %2770 = vmatmul.msk.f32.gmra.mxu0 %vm845_vm12, %v1106_v60 }
 0x4e6   : > { %2771 = vmatmul.msk.f32.gmra.mxu0 %vm845_vm12, %v1107_v13  ;;  %v3239_v13 = vmov 0.0  }
 0x52b   : > { %v1152_v4 = vpop.f32.mrf.mxu0 }
 0x52c   : > { %v1153_v0 = vadd.f32 %v3102_v8, %v1152_v4 }
 0x52e   : > { %v1184_v39 = vadd.f32 %v1176_v37, %v1153_v0 }
 0x533   : > { %v1155_v9 = vpop.f32.mrf.mxu0 }
 0x534   : > { %v1156_v58 = vadd.f32 %v3102_v8, %v1155_v9 }
 0x536   : > { %v1185_v42 = vadd.f32 %v1177_v41, %v1156_v58 }
 0x53b   : > { %v1158_v28 = vpop.f32.mrf.mxu0 }
 0x53c   : > { %v1159_v36 = vadd.f32 %v3102_v8, %v1158_v28 }
 0x53e   : > { %v1186_v40 = vadd.f32 %v1178_v38, %v1159_v36 }
 0x543   : > { %v1161_v27 = vpop.f32.mrf.mxu0 }
 0x544   : > { %v1162_v32 = vadd.f32 %v3102_v8, %v1161_v27 }
 0x546   : > { %v1187_v35 = vadd.f32 %v1179_v34, %v1162_v32 }
 0x54b   : > { %v1164_v23 = vpop.f32.mrf.mxu0 }
 0x54c   : > { %v1165_v17 = vadd.f32 %v3102_v8, %v1164_v23 }
 0x54e   : > { %v1188_v29 = vadd.f32 %v1180_v12, %v1165_v17 }
 0x550   : > { %1208 = vrot.lane.b32.xlu2 %v1188_v29, %s3237_s26 }
 0x553   : > { %v1167_v31 = vpop.f32.mrf.mxu0 }
 0x554   : > { %v1168_v48 = vadd.f32 %v3102_v8, %v1167_v31 }
 0x556   : > { %v1189_v54 = vadd.f32 %v1181_v49, %v1168_v48 }
 0x558   : > { %1206 = vrot.lane.b32.xlu2 %v1187_v35, %s3237_s26 }
 0x55b   : > { %v1170_v43 = vpop.f32.mrf.mxu0 }
 0x55c   : > { %v1171_v46 = vadd.f32 %v3102_v8, %v1170_v43  ;;  %v3240_v43 = vmov 0  }
 0x55e   : > { %v1190_v47 = vadd.f32 %v1182_v44, %v1171_v46 }
 0x560   : > { %1212 = vrot.lane.b32.xlu1 %v1190_v47, %s3237_s26 }
 0x563   : > { %v1173_v50 = vpop.f32.mrf.mxu0 }
 0x564   : > { %v1174_v52 = vadd.f32 %v3102_v8, %v1173_v50 }
 0x566   : > { %v1191_v63 = vadd.f32 %v1183_v51, %v1174_v52 }
 0x568   : > { %1210 = vrot.lane.b32.xlu1 %v1189_v54, %s3237_s26  ;;  %1214 = vrot.lane.b32.xlu0 %v1191_v63, %s3237_s26 }
 0x570   : > { %1200 = vrot.lane.b32.xlu1 %v1184_v39, %s3237_s26  ;;  %1204 = vrot.lane.b32.xlu0 %v1186_v40, %s3237_s26 }
 0x578   : > { %1202 = vrot.lane.b32.xlu0 %v1185_v42, %s3237_s26 }
 0x5aa   : > { %v1209_v7 = vpop.permute.xlu2 %1208 }
 0x5ab   : > { %vm1228_vm13 = vcmp.ge.f32.partialorder %v1188_v29, %v1209_v7 }
 0x5ac   : > { %v2776_v4 = vsel %vm1228_vm13, 1.0, %v3239_v13 }
 0x5b2   : > { %v1207_v12 = vpop.permute.xlu2 %1206 }
 0x5b3   : > { %vm1227_vm2 = vcmp.ge.f32.partialorder %v1187_v35, %v1207_v12 }
 0x5b4   : > { %v2775_v29 = vsel %vm1227_vm2, 1.0, %v3239_v13 }
 0x5d2   : > { %v1213_v5 = vpop.permute.xlu1 %1212 }
 0x5d3   : > { %vm1230_vm14 = vcmp.ge.f32.partialorder %v1190_v47, %v1213_v5 }
 0x5d4   : > { %v2778_v9 = vsel %vm1230_vm14, 1.0, %v3239_v13 }
 0x5da   : > { %v1211_v60 = vpop.permute.xlu1 %1210  ;;  %v1215_v2 = vpop.permute.xlu0 %1214 }
 0x5db   : > { %vm1229_vm15 = vcmp.ge.f32.partialorder %v1189_v54, %v1211_v60  ;;  %vm1231_vm0 = vcmp.ge.f32.partialorder %v1191_v63, %v1215_v2 }
 0x5dc   : > { %v2777_v28 = vsel %vm1229_vm15, 1.0, %v3239_v13  ;;  %v2779_v27 = vsel %vm1231_vm0, 1.0, %v3239_v13 }
 0x5dd   : > { %v2975_v8 = vpack.i.bf16 %v2777_v28, %v2776_v4  ;;  %v2969_v23 = vpack.i.bf16 %v2779_v27, %v2778_v9  ;;  %v3900_v27 = vpack.c.bf16 %v3602_v15, %v3590_v20  ;;  %v3918_v20 = vpack.c.bf16 %v3625_v26, %v3615_v16 }
 0x5df   : > { %2970 = vperm.xlu2 %2968, %v2969_v23   ;;  %2976 = vperm.xlu1 %2974, %v2975_v8  }
 0x5e2   : > { %v1205_v17 = vpop.permute.xlu0 %1204  ;;  %v1201_v31 = vpop.permute.xlu1 %1200 }
 0x5e3   : > { %vm1226_vm3 = vcmp.ge.f32.partialorder %v1186_v40, %v1205_v17  ;;  %vm1224_vm4 = vcmp.ge.f32.partialorder %v1184_v39, %v1201_v31 }
 0x5e4   : > { %v2774_v32 = vsel %vm1226_vm3, 1.0, %v3239_v13  ;;  %v2772_v46 = vsel %vm1224_vm4, 1.0, %v3239_v13 }
 0x5e5   : > { %v2981_v34 = vpack.i.bf16 %v2775_v29, %v2774_v32 }
 0x5e7   : > { %2982 = vperm.xlu0 %2980, %v2981_v34   ;;  %2991 = vset.pattern.permute.xlu1 %v3240_v43 }
 0x5ea   : > { %v1203_v44 = vpop.permute.xlu0 %1202 }
 0x5eb   : > { %vm1225_vm5 = vcmp.ge.f32.partialorder %v1185_v42, %v1203_v44 }
 0x5ec   : > { %v2773_v47 = vsel %vm1225_vm5, 1.0, %v3239_v13 }
 0x5ed   : > { %v2992_v35 = vpack.i.bf16 %v2773_v47, %v2772_v46 }
 0x5ef   : > { %2987 = vperm.xlu2 %2968, %v2992_v35   ;;  %2993 = vperm.xlu1 %2991, %v2992_v35   ;;  %v2906_v35 = vld [vmem:[%s4555_s11 + $0x18] sm:$0xff] }
 0x5f0   : > { %1477 = vmatpush.bf16.msra.mxu2 %v2906_v35  ;;  %v3103_v35 = vld [vmem:[%s4556_s12] ss:$0 sm:$0xff] }
 0x5f7   : > { %2997 = vset.pattern.permute.xlu2 %v3240_v43  ;;  %3004 = vperm.xlu1 %2991, %v2975_v8   ;;  %v3906_v8 = vpack.c.bf16 %v3622_v25, %v3612_v24 }
 0x5f8   : > { %2999 = vperm.xlu2 %2997, %v2981_v34  }
 0x5ff   : > { %3033 = vset.pattern.permute.xlu1 %v3238_v3 }
 0x600   : > { %3014 = vperm.xlu2 %2997, %v2969_v23   ;;  %v3912_v23 = vpack.c.bf16 %v3605_v22, %v3593_v21 }
 0x608   : > { %3039 = vset.pattern.permute.xlu2 %v3238_v3 }
 0x639   : > { %v2971_v48 = vpop.permute.xlu2 %2970 }
 0x63a   : > { %v2973_v49 = vunpack.i.h.bf16 %v2971_v48  ;;  %v2972_v50 = vunpack.i.l.bf16 %v2971_v48  ;;  %v2905_v48 = vld [vmem:[%s4555_s11 + $0x10] sm:$0xff] }
 0x63b   : > { %1478 = vmatpush.bf16.msra.mxu2 %v2905_v48 }
 0x63c   : > { %v1294_v51 = vmul.f32 %v2972_v50, %v3539_v55  ;;  %v1295_v52 = vmul.f32 %v2973_v49, %v3510_v30  ;;  %v2904_v50 = vld [vmem:[%s4555_s11 + $0x8] sm:$0xff] }
 0x63e   : > { %v1299_v54 = vpack.c.bf16 %v1295_v52, %v1294_v51 }
 0x63f   : > { %1479 = vmatpush.bf16.msra.mxu2 %v2904_v50 }
 0x640   : > { %1316 = vmatpush.bf16.msrb.mxu1 %v1299_v54 }
 0x649   : > { %v2988_v40 = vpop.permute.xlu2 %2987 }
 0x64a   : > { %v2990_v41 = vunpack.i.h.bf16 %v2988_v40  ;;  %v2989_v42 = vunpack.i.l.bf16 %v2988_v40 }
 0x64c   : > { %v1288_v4 = vmul.f32 %v2989_v42, %v3587_v19  ;;  %v1289_v9 = vmul.f32 %v2990_v41, %v3572_v18 }
 0x64e   : > { %v1296_v28 = vpack.c.bf16 %v1289_v9, %v1288_v4 }
 0x651   : > { %v2977_v63 = vpop.permute.xlu1 %2976 }
 0x652   : > { %v2979_v0 = vunpack.i.h.bf16 %v2977_v63  ;;  %v2978_v36 = vunpack.i.l.bf16 %v2977_v63  ;;  %v3000_v22 = vpop.permute.xlu2 %2999 }
 0x653   : > { %v3002_v31 = vunpack.i.h.bf16 %v3000_v22  ;;  %v3001_v44 = vunpack.i.l.bf16 %v3000_v22 }
 0x654   : > { %v1292_v37 = vmul.f32 %v2978_v36, %v3550_v1  ;;  %v1293_v38 = vmul.f32 %v2979_v0, %v3543_v59 }
 0x656   : > { %v1298_v39 = vpack.c.bf16 %v1293_v38, %v1292_v37 }
 0x658   : > { %1317 = vmatpush.bf16.msrb.mxu1 %v1298_v39 }
 0x659   : > { %v2983_v58 = vpop.permute.xlu0 %2982 }
 0x65a   : > { %v2985_v3 = vunpack.i.h.bf16 %v2983_v58  ;;  %v2984_v5 = vunpack.i.l.bf16 %v2983_v58  ;;  %v3015_v39 = vpop.permute.xlu2 %3014 }
 0x65b   : > { %v3017_v40 = vunpack.i.h.bf16 %v3015_v39  ;;  %v3016_v58 = vunpack.i.l.bf16 %v3015_v39 }
 0x65c   : > { %v1290_v7 = vmul.f32 %v2984_v5, %v3566_v10  ;;  %v1291_v60 = vmul.f32 %v2985_v3, %v3562_v14 }
 0x65e   : > { %v1297_v2 = vpack.c.bf16 %v1291_v60, %v1290_v7  ;;  %v2903_v7 = vld [vmem:[%s4555_s11] sm:$0xff] }
 0x65f   : > { %1480 = vmatpush.bf16.msra.mxu2 %v2903_v7 }
 0x660   : > { %1318 = vmatpush.bf16.msrb.mxu1 %v1297_v2 }
 0x661   : > { %v2994_v24 = vpop.permute.xlu1 %2993 }
 0x662   : > { %v2996_v25 = vunpack.i.h.bf16 %v2994_v24  ;;  %v2995_v12 = vunpack.i.l.bf16 %v2994_v24 }
 0x663   : > { %1977 = vmatpush.msrb.mxu2 %v3774_v6 }
 0x664   : > { %1319 = vmatpush.bf16.msrb.mxu1 %v1296_v28 }
 0x665   : > { %1978 = vmatpush.msrb.mxu2 %v3779_v11 }
 0x667   : > { %2780 = vmatmul.msk.bf16.vlgmr.msrb.gmra.mxu1 %vm845_vm12, %v3900_v27  ;;  %1979 = vmatpush.msrb.mxu2 %v3785_v33 }
 0x669   : > { %v3005_v51 = vpop.permute.xlu1 %3004  ;;  %1980 = vmatpush.msrb.mxu2 %v3791_v56 }
 0x66a   : > { %v3007_v52 = vunpack.i.h.bf16 %v3005_v51  ;;  %v3006_v54 = vunpack.i.l.bf16 %v3005_v51 }
 0x66b   : > { %1981 = vmatpush.msrb.mxu2 %v3797_v57 }
 0x66d   : > { %1982 = vmatpush.msrb.mxu2 %v3803_v61 }
 0x66f   : > { %1983 = vmatpush.msrb.mxu2 %v3809_v45 }
 0x671   : > { %1984 = vmatpush.msrb.mxu2 %v3816_v62 }
 0x677   : > { %2781 = vmatmul.msk.bf16.gmra.mxu1 %vm845_vm12, %v3906_v8 }
 0x687   : > { %2782 = vmatmul.msk.bf16.gmra.mxu1 %vm845_vm12, %v3912_v23 }
 0x697   : > { %2783 = vmatmul.msk.bf16.gmra.mxu1 %vm845_vm12, %v3918_v20 }
 0x6e4   : > { %v1321_v15 = vpop.f32.mrf.mxu1 }
 0x6e5   : > { %v1373_v29 = vmul.f32 %v2995_v12, %v1321_v15 }
 0x6ec   : > { %v1323_v17 = vpop.f32.mrf.mxu1 }
 0x6ed   : > { %v1374_v32 = vmul.f32 %v2996_v25, %v1323_v17 }
 0x6ef   : > { %v3008_v34 = vpack.i.bf16 %v1374_v32, %v1373_v29 }
 0x6f1   : > { %3009 = vrot.lane.b32.xlu0 %v3008_v34, %s4577_s16 }
 0x6f4   : > { %v1326_v21 = vpop.f32.mrf.mxu1 }
 0x6f5   : > { %v1375_v16 = vmul.f32 %v3001_v44, %v1326_v21 }
 0x6fc   : > { %v1328_v46 = vpop.f32.mrf.mxu1 }
 0x6fd   : > { %v1376_v26 = vmul.f32 %v3002_v31, %v1328_v46 }
 0x6ff   : > { %v3018_v47 = vpack.i.bf16 %v1376_v26, %v1375_v16 }
 0x701   : > { %3019 = vrot.lane.b32.xlu1 %v3018_v47, %s4577_s16 }
 0x704   : > { %v1331_v49 = vpop.f32.mrf.mxu1 }
 0x705   : > { %v1377_v0 = vmul.f32 %v3006_v54, %v1331_v49 }
 0x70c   : > { %v1333_v63 = vpop.f32.mrf.mxu1 }
 0x70d   : > { %v1378_v36 = vmul.f32 %v3007_v52, %v1333_v63 }
 0x70f   : > { %v3023_v37 = vpack.i.bf16 %v1378_v36, %v1377_v0 }
 0x711   : > { %3024 = vrot.lane.b32.xlu0 %v3023_v37, %s4577_s16 }
 0x714   : > { %v1336_v38 = vpop.f32.mrf.mxu1 }
 0x715   : > { %v1379_v42 = vmul.f32 %v3016_v58, %v1336_v38 }
 0x71c   : > { %v1338_v41 = vpop.f32.mrf.mxu1 }
 0x71d   : > { %v1380_v3 = vmul.f32 %v3017_v40, %v1338_v41 }
 0x71f   : > { %v3028_v5 = vpack.i.bf16 %v1380_v3, %v1379_v42 }
 0x721   : > { %3029 = vrot.lane.b32.xlu2 %v3028_v5, %s4577_s16 }
 0x763   : > { %v3010_v60 = vpop.permute.xlu0 %3009 }
 0x764   : > { %v3012_v2 = vunpack.i.h.bf16 %v3010_v60  ;;  %v3011_v4 = vunpack.i.l.bf16 %v3010_v60 }
 0x766   : > { %v1414_v6 = vsel %vm639_vm1, %v3572_v18, %v3012_v2  ;;  %v1413_v11 = vsel %vm639_vm1, %v3587_v19, %v3011_v4 }
 0x767   : > { %v1421_v33 = vpack.c.bf16 %v1414_v6, %v1413_v11 }
 0x769   : > { %2800 = vmatmul.msk.bf16.vlgmr.msra.gmra.mxu2 %vm845_vm12, %v1421_v33 }
 0x773   : > { %v3020_v56 = vpop.permute.xlu1 %3019 }
 0x774   : > { %v3022_v57 = vunpack.i.h.bf16 %v3020_v56  ;;  %v3021_v9 = vunpack.i.l.bf16 %v3020_v56 }
 0x776   : > { %v1415_v61 = vsel %vm639_vm1, %v3566_v10, %v3021_v9  ;;  %v1416_v45 = vsel %vm639_vm1, %v3562_v14, %v3022_v57 }
 0x777   : > { %v1422_v62 = vpack.c.bf16 %v1416_v45, %v1415_v61 }
 0x779   : > { %2801 = vmatmul.msk.bf16.gmra.mxu2 %vm845_vm12, %v1422_v62 }
 0x77b   : > { %v3030_v29 = vpop.permute.xlu2 %3029 }
 0x77c   : > { %v3032_v32 = vunpack.i.h.bf16 %v3030_v29  ;;  %v3031_v34 = vunpack.i.l.bf16 %v3030_v29 }
 0x77e   : > { %v1419_v21 = vsel %vm639_vm1, %v3539_v55, %v3031_v34  ;;  %v1420_v22 = vsel %vm639_vm1, %v3510_v30, %v3032_v32 }
 0x77f   : > { %v1424_v31 = vpack.c.bf16 %v1420_v22, %v1419_v21 }
 0x783   : > { %v3025_v28 = vpop.permute.xlu0 %3024 }
 0x784   : > { %v3027_v15 = vunpack.i.h.bf16 %v3025_v28  ;;  %v3026_v24 = vunpack.i.l.bf16 %v3025_v28 }
 0x786   : > { %v1417_v25 = vsel %vm639_vm1, %v3550_v1, %v3026_v24  ;;  %v1418_v12 = vsel %vm639_vm1, %v3543_v59, %v3027_v15 }
 0x787   : > { %v1423_v17 = vpack.c.bf16 %v1418_v12, %v1417_v25 }
 0x789   : > { %2802 = vmatmul.msk.bf16.gmra.mxu2 %vm845_vm12, %v1423_v17 }
 0x799   : > { %2803 = vmatmul.msk.bf16.gmra.mxu2 %vm845_vm12, %v1424_v31 }
 0x7ec   : > { %v1482_v44 = vpop.f32.mrf.mxu2 }
 0x7ed   : > { %v1483_v5 = vadd.f32 %v3103_v35, %v1482_v44 }
 0x7ef   : > { %v1502_v6 = vmax.f32 %v1483_v5, 0.0 }
 0x7f1   : > { %v1510_v57 = vadd.f32 %v1502_v6, %v3587_v19 }
 0x7f4   : > { %v1484_v46 = vpop.f32.mrf.mxu2 }
 0x7f5   : > { %v1485_v33 = vadd.f32 %v3103_v35, %v1484_v46 }
 0x7f7   : > { %v1503_v9 = vmax.f32 %v1485_v33, 0.0 }
 0x7fc   : > { %v1487_v16 = vpop.f32.mrf.mxu2 }
 0x7fd   : > { %v1488_v50 = vadd.f32 %v3103_v35, %v1487_v16 }
 0x7ff   : > { %v1504_v54 = vmax.f32 %v1488_v50, 0.0 }
 0x801   : > { %v1512_v39 = vadd.f32 %v1504_v54, %v3566_v10 }
 0x803   : > { %v1524_v41 = vsel %vm639_vm1, %v1512_v39, 0.0 }
 0x804   : > { %v1489_v26 = vpop.f32.mrf.mxu2 }
 0x805   : > { %v1490_v37 = vadd.f32 %v3103_v35, %v1489_v26 }
 0x807   : > { %v1505_v58 = vmax.f32 %v1490_v37, 0.0 }
 0x809   : > { %v1513_v2 = vadd.f32 %v1505_v58, %v3562_v14  ;;  %v1518_v14 = vsel %vm639_vm1, %v1510_v57, 0.0 }
 0x80b   : > { %v1527_v11 = vsel %vm639_vm1, %v1513_v2, 0.0 }
 0x80c   : > { %v1492_v47 = vpop.f32.mrf.mxu2 }
 0x80d   : > { %v1493_v7 = vadd.f32 %v3103_v35, %v1492_v47 }
 0x80f   : > { %v1506_v10 = vmax.f32 %v1493_v7, 0.0 }
 0x811   : > { %v1514_v56 = vadd.f32 %v1506_v10, %v3550_v1 }
 0x813   : > { %v1530_v61 = vsel %vm639_vm1, %v1514_v56, 0.0 }
 0x814   : > { %v1494_v48 = vpop.f32.mrf.mxu2 }
 0x815   : > { %v1495_v49 = vadd.f32 %v3103_v35, %v1494_v48 }
 0x817   : > { %v1507_v51 = vmax.f32 %v1495_v49, 0.0 }
 0x819   : > { %v1515_v52 = vadd.f32 %v1507_v51, %v3543_v59 }
 0x81b   : > { %v1533_v63 = vsel %vm639_vm1, %v1515_v52, 0.0 }
 0x81c   : > { %1534 = vadd.xlane.f32.xlu2 %v1533_v63  ;;  %v1497_v0 = vpop.f32.mrf.mxu2 }
 0x81d   : > { %v1498_v36 = vadd.f32 %v3103_v35, %v1497_v0 }
 0x81f   : > { %v1508_v38 = vmax.f32 %v1498_v36, 0.0 }
 0x821   : > { %v1516_v40 = vadd.f32 %v1508_v38, %v3539_v55 }
 0x823   : > { %v1536_v42 = vsel %vm639_vm1, %v1516_v40, 0.0 }
 0x824   : > { %1525 = vadd.xlane.f32.xlu2 %v1524_v41  ;;  %v1499_v3 = vpop.f32.mrf.mxu2  ;;  %1537 = vadd.xlane.f32.xlu0 %v1536_v42 }
 0x825   : > { %v1500_v59 = vadd.f32 %v3103_v35, %v1499_v3 }
 0x827   : > { %v1509_v60 = vmax.f32 %v1500_v59, 0.0 }
 0x829   : > { %v1517_v4 = vadd.f32 %v1509_v60, %v3510_v30  ;;  %v1511_v30 = vadd.f32 %v1503_v9, %v3572_v18 }
 0x82b   : > { %v1539_v55 = vsel %vm639_vm1, %v1517_v4, 0.0  ;;  %v1521_v45 = vsel %vm639_vm1, %v1511_v30, 0.0 }
 0x82c   : > { %1540 = vadd.xlane.f32.xlu1 %v1539_v55  ;;  %1528 = vadd.xlane.f32.xlu0 %v1527_v11 }
 0x834   : > { %1531 = vadd.xlane.f32.xlu1 %v1530_v61  ;;  %1519 = vadd.xlane.f32.xlu0 %v1518_v14 }
 0x83c   : > { %1522 = vadd.xlane.f32.xlu1 %v1521_v45 }
 0x88f   : > { %v1535_v62 = vpop.xlane.xlu2 %1534 }
 0x890   : > { %v1547_v28 = vmul.f32 %v1535_v62, %v3404_v53 }
 0x892   : > { %v3986_v15 = vsub.f32 %v1515_v52, %v1547_v28 }
 0x894   : > { %v1563_v1 = vmul.f32 %v3986_v15, %v3986_v15 }
 0x896   : > { %v1581_v19 = vsel %vm639_vm1, %v1563_v1, 0.0 }
 0x897   : > { %v1526_v24 = vpop.xlane.xlu2 %1525  ;;  %1582 = vadd.xlane.f32.xlu0 %v1581_v19  ;;  %v1538_v25 = vpop.xlane.xlu0 %1537 }
 0x898   : > { %v1544_v12 = vmul.f32 %v1526_v24, %v3404_v53  ;;  %v1548_v18 = vmul.f32 %v1538_v25, %v3404_v53 }
 0x89a   : > { %v3993_v17 = vsub.f32 %v1512_v39, %v1544_v12  ;;  %v3995_v29 = vsub.f32 %v1516_v40, %v1548_v18 }
 0x89c   : > { %v1560_v32 = vmul.f32 %v3993_v17, %v3993_v17  ;;  %v1564_v34 = vmul.f32 %v3995_v29, %v3995_v29 }
 0x89e   : > { %v1572_v21 = vsel %vm639_vm1, %v1560_v32, 0.0  ;;  %v1584_v22 = vsel %vm639_vm1, %v1564_v34, 0.0 }
 0x89f   : > { %v1541_v31 = vpop.xlane.xlu1 %1540  ;;  %1573 = vadd.xlane.f32.xlu0 %v1572_v21  ;;  %1585 = vadd.xlane.f32.xlu1 %v1584_v22  ;;  %v1529_v44 = vpop.xlane.xlu0 %1528 }
 0x8a0   : > { %v1549_v46 = vmul.f32 %v1541_v31, %v3404_v53  ;;  %v1545_v16 = vmul.f32 %v1529_v44, %v3404_v53 }
 0x8a2   : > { %v4005_v26 = vsub.f32 %v1517_v4, %v1549_v46  ;;  %v4007_v47 = vsub.f32 %v1513_v2, %v1545_v16 }
 0x8a4   : > { %v1565_v35 = vmul.f32 %v4005_v26, %v4005_v26  ;;  %v1561_v48 = vmul.f32 %v4007_v47, %v4007_v47 }
 0x8a6   : > { %v1587_v49 = vsel %vm639_vm1, %v1565_v35, 0.0  ;;  %v1575_v50 = vsel %vm639_vm1, %v1561_v48, 0.0 }
 0x8a7   : > { %1588 = vadd.xlane.f32.xlu2 %v1587_v49  ;;  %v1532_v51 = vpop.xlane.xlu1 %1531  ;;  %1576 = vadd.xlane.f32.xlu1 %v1575_v50  ;;  %v1520_v52 = vpop.xlane.xlu0 %1519 }
 0x8a8   : > { %v1546_v54 = vmul.f32 %v1532_v51, %v3404_v53  ;;  %v1542_v63 = vmul.f32 %v1520_v52, %v3404_v53 }
 0x8aa   : > { %v4017_v0 = vsub.f32 %v1514_v56, %v1546_v54  ;;  %v4019_v36 = vsub.f32 %v1510_v57, %v1542_v63 }
 0x8ac   : > { %v1562_v37 = vmul.f32 %v4017_v0, %v4017_v0  ;;  %v1558_v38 = vmul.f32 %v4019_v36, %v4019_v36 }
 0x8ae   : > { %v1578_v39 = vsel %vm639_vm1, %v1562_v37, 0.0  ;;  %v1566_v40 = vsel %vm639_vm1, %v1558_v38, 0.0 }
 0x8af   : > { %1579 = vadd.xlane.f32.xlu2 %v1578_v39  ;;  %v1523_v58 = vpop.xlane.xlu1 %1522  ;;  %1567 = vadd.xlane.f32.xlu1 %v1566_v40 }
 0x8b0   : > { %v1543_v41 = vmul.f32 %v1523_v58, %v3404_v53 }
 0x8b2   : > { %v4028_v42 = vsub.f32 %v1511_v30, %v1543_v41 }
 0x8b4   : > { %v1559_v3 = vmul.f32 %v4028_v42, %v4028_v42 }
 0x8b6   : > { %v1569_v59 = vsel %vm639_vm1, %v1559_v3, 0.0 }
 0x8b7   : > { %1570 = vadd.xlane.f32.xlu2 %v1569_v59 }
 0x90a   : > { %v1583_v5 = vpop.xlane.xlu0 %1582 }
 0x90b   : > { %v1595_v7 = vmul.f32 %v1583_v5, %v3404_v53 }
 0x90d   : > { %v1603_v60 = vadd.f32 1e-05, %v1595_v7 }
 0x90f   : > { %3123 = vrsqrt.f32 %v1603_v60  ;;  %vm1662_vm10 = vweird.f32 %v1603_v60 }
 0x912   : > { %v1586_v2 = vpop.xlane.xlu1 %1585  ;;  %v1574_v4 = vpop.xlane.xlu0 %1573 }
 0x913   : > { %v1596_v6 = vmul.f32 %v1586_v2, %v3404_v53  ;;  %v1592_v10 = vmul.f32 %v1574_v4, %v3404_v53 }
 0x915   : > { %v1604_v55 = vadd.f32 1e-05, %v1596_v6  ;;  %v4036_v11 = vadd.f32 1e-05, %v1592_v10  ;;  %v4038_v33 = vpop.eup %3123 }
 0x916   : > { %v1657_v56 = vmul.f32 %v4038_v33, %v1603_v60  ;;  %vm1663_vm7 = vweird.f32 %v4038_v33 }
 0x917   : > { %3125 = vrsqrt.f32 %v1604_v55  ;;  %vm1672_vm8 = vweird.f32 %v1604_v55  ;;  %vm4077_vm13 = vmor %vm1662_vm10, %vm1663_vm7  ;;  %vm1632_vm5 = vweird.f32 %v4036_v11 }
 0x918   : > { %3127 = vrsqrt.f32 %v4036_v11  ;;  %v1658_v28 = vmul.f32 %v4038_v33, %v1657_v56 }
 0x91a   : > { %v1589_v57 = vpop.xlane.xlu2 %1588  ;;  %v1577_v9 = vpop.xlane.xlu1 %1576  ;;  %v1659_v25 = vmul.f32 0.5, %v1658_v28 }
 0x91b   : > { %v1597_v61 = vmul.f32 %v1589_v57, %v3404_v53  ;;  %v1593_v14 = vmul.f32 %v1577_v9, %v3404_v53 }
 0x91c   : > { %v1660_v48 = vsub.f32 1.5, %v1659_v25  ;;  %v3157_v25 = vld [vmem:[%s4549_s5] ss:$0 sm:$0xff] }
 0x91d   : > { %v3126_v30 = vpop.eup %3125  ;;  %v1605_v45 = vadd.f32 1e-05, %v1597_v61  ;;  %v4044_v62 = vadd.f32 1e-05, %v1593_v14 }
 0x91e   : > { %v1667_v1 = vmul.f32 %v3126_v30, %v1604_v55  ;;  %v4047_v19 = vpop.eup %3127  ;;  %vm1673_vm6 = vweird.f32 %v3126_v30  ;;  %v1661_v37 = vmul.f32 %v4038_v33, %v1660_v48 }
 0x91f   : > { %3129 = vrsqrt.f32 %v1605_v45  ;;  %v1627_v18 = vmul.f32 %v4047_v19, %v4036_v11  ;;  %vm4068_vm9 = vmor %vm1672_vm8, %vm1673_vm6  ;;  %vm1682_vm14 = vweird.f32 %v1605_v45  ;;  %vm1633_vm2 = vweird.f32 %v4047_v19 }
 0x920   : > { %v1668_v24 = vmul.f32 %v3126_v30, %v1667_v1  ;;  %3131 = vrsqrt.f32 %v4044_v62  ;;  %v1665_v60 = vsel %vm4077_vm13, %v4038_v33, %v1661_v37  ;;  %vm1642_vm3 = vweird.f32 %v4044_v62  ;;  %vm4112_vm7 = vmor %vm1632_vm5, %vm1633_vm2 }
 0x921   : > { %v1628_v49 = vmul.f32 %v4047_v19, %v1627_v18  ;;  %v1691_v33 = vmul.f32 %v1665_v60, %v3986_v15  ;;  %v4179_v60 = vld [vmem:[%s3581_s25 + $0x10] sm:$0xff] }
 0x922   : > { %v1669_v12 = vmul.f32 0.5, %v1668_v24  ;;  %v1580_v32 = vpop.xlane.xlu2 %1579  ;;  %v1568_v34 = vpop.xlane.xlu1 %1567 }
 0x923   : > { %v1594_v21 = vmul.f32 %v1580_v32, %v3404_v53  ;;  %v1590_v22 = vmul.f32 %v1568_v34, %v3404_v53  ;;  %v1629_v38 = vmul.f32 0.5, %v1628_v49 }
 0x924   : > { %v1670_v31 = vsub.f32 1.5, %v1669_v12 }
 0x925   : > { %v3130_v44 = vpop.eup %3129  ;;  %v4054_v46 = vadd.f32 1e-05, %v1594_v21  ;;  %v4056_v16 = vadd.f32 1e-05, %v1590_v22  ;;  %v1630_v55 = vsub.f32 1.5, %v1629_v38  ;;  %v1699_v21 = vmul.f32 %v3157_v25, %v1691_v33 }
 0x926   : > { %v4058_v35 = vpop.eup %3131  ;;  %v1677_v50 = vmul.f32 %v3130_v44, %v1605_v45  ;;  %v1671_v52 = vmul.f32 %v3126_v30, %v1670_v31  ;;  %vm1683_vm11 = vweird.f32 %v3130_v44 }
 0x927   : > { %v1637_v51 = vmul.f32 %v4058_v35, %v4044_v62  ;;  %3133 = vrsqrt.f32 %v4054_v46  ;;  %vm1684_vm15 = vmor %vm1682_vm14, %vm1683_vm11  ;;  %vm1643_vm0 = vweird.f32 %v4058_v35  ;;  %vm1652_vm8 = vweird.f32 %v4054_v46 }
 0x928   : > { %v1678_v54 = vmul.f32 %v3130_v44, %v1677_v50  ;;  %3135 = vrsqrt.f32 %v4056_v16  ;;  %v1675_v59 = vsel %vm4068_vm9, %v3126_v30, %v1671_v52  ;;  %vm4104_vm4 = vmor %vm1642_vm3, %vm1643_vm0  ;;  %vm1612_vm11 = vweird.f32 %v4056_v16 }
 0x929   : > { %v1638_v63 = vmul.f32 %v4058_v35, %v1637_v51  ;;  %v1692_v9 = vmul.f32 %v1675_v59, %v3995_v29  ;;  %v1631_v29 = vmul.f32 %v4047_v19, %v1630_v55  ;;  %v4184_v55 = vld [vmem:[%s3581_s25 + $0x18] sm:$0xff] }
 0x92a   : > { %v1679_v39 = vmul.f32 0.5, %v1678_v54  ;;  %v1571_v40 = vpop.xlane.xlu2 %1570 }
 0x92b   : > { %v1639_v41 = vmul.f32 0.5, %v1638_v63  ;;  %v1591_v3 = vmul.f32 %v1571_v40, %v3404_v53  ;;  %v1700_v12 = vmul.f32 %v3157_v25, %v1692_v9  ;;  %v4199_v9 = vld [vmem:[%s3581_s25 + $0x30] sm:$0xff] }
 0x92c   : > { %v1680_v5 = vsub.f32 1.5, %v1679_v39 }
 0x92d   : > { %v3134_v7 = vpop.eup %3133  ;;  %v1640_v4 = vsub.f32 1.5, %v1639_v41  ;;  %v4081_v6 = vadd.f32 1e-05, %v1591_v3 }
 0x92e   : > { %v4083_v10 = vpop.eup %3135  ;;  %v1681_v56 = vmul.f32 %v3130_v44, %v1680_v5  ;;  %v1647_v57 = vmul.f32 %v3134_v7, %v4054_v46  ;;  %vm1653_vm6 = vweird.f32 %v3134_v7 }
 0x92f   : > { %v1607_v61 = vmul.f32 %v4083_v10, %v4056_v16  ;;  %3137 = vrsqrt.f32 %v4081_v6  ;;  %v1641_v30 = vmul.f32 %v4058_v35, %v1640_v4  ;;  %vm1654_vm9 = vmor %vm1652_vm8, %vm1653_vm6  ;;  %vm1613_vm10 = vweird.f32 %v4083_v10 }
 0x930   : > { %v1685_v14 = vsel %vm1684_vm15, %v3130_v44, %v1681_v56  ;;  %v1648_v45 = vmul.f32 %v3134_v7, %v1647_v57  ;;  %v4119_v44 = vld [vmem:[%s4550_s6] ss:$0 sm:$0xff]  ;;  %vm1614_vm13 = vmor %vm1612_vm11, %vm1613_vm10  ;;  %vm1622_vm15 = vweird.f32 %v4081_v6  ;;  %v4194_v57 = vld [vmem:[%s3581_s25 + $0x28] sm:$0xff] }
 0x931   : > { %v1693_v28 = vmul.f32 %v1685_v14, %v4005_v26  ;;  %v1608_v1 = vmul.f32 %v4083_v10, %v1607_v61  ;;  %v1645_v26 = vsel %vm4104_vm4, %v4058_v35, %v1641_v30  ;;  %v1635_v35 = vsel %vm4112_vm7, %v4047_v19, %v1631_v29  ;;  %v4189_v56 = vld [vmem:[%s3581_s25 + $0x20] sm:$0xff]  ;;  %v4204_v61 = vld [vmem:[%s3581_s25 + $0x38] sm:$0xff] }
 0x932   : > { %v1649_v24 = vmul.f32 0.5, %v1648_v45  ;;  %v1689_v50 = vmul.f32 %v1645_v26, %v4007_v47  ;;  %v4132_v51 = vadd.f32 %v4119_v44, %v1700_v12  ;;  %v1688_v19 = vmul.f32 %v1635_v35, %v3993_v17 }
 0x933   : > { %v1701_v18 = vmul.f32 %v3157_v25, %v1693_v28  ;;  %v1609_v15 = vmul.f32 0.5, %v1608_v1  ;;  %v4140_v47 = vadd.f32 %v4119_v44, %v1699_v21 }
 0x934   : > { %v1650_v34 = vsub.f32 1.5, %v1649_v24  ;;  %v1697_v38 = vmul.f32 %v3157_v25, %v1689_v50  ;;  %v1696_v17 = vmul.f32 %v3157_v25, %v1688_v19 }
 0x935   : > { %v3138_v62 = vpop.eup %3137  ;;  %v1610_v31 = vsub.f32 1.5, %v1609_v15  ;;  %v4122_v11 = vadd.f32 %v4119_v44, %v1701_v18 }
 0x936   : > { %v1651_v48 = vmul.f32 %v3134_v7, %v1650_v34  ;;  %v1617_v49 = vmul.f32 %v3138_v62, %v4081_v6  ;;  %vm1623_vm14 = vweird.f32 %v3138_v62  ;;  %v4152_v3 = vadd.f32 %v4119_v44, %v1697_v38  ;;  %v4169_v6 = vld [vmem:[%s3581_s25] sm:$0xff] }
 0x937   : > { %1718 = vmatpush.msra.mxu3 %v4122_v11  ;;  %v1611_v54 = vmul.f32 %v4083_v10, %v1610_v31  ;;  %vm1624_vm0 = vmor %vm1622_vm15, %vm1623_vm14 }
 0x938   : > { %v1655_v52 = vsel %vm1654_vm9, %v3134_v7, %v1651_v48  ;;  %v1618_v63 = vmul.f32 %v3138_v62, %v1617_v49  ;;  %v4157_v7 = vadd.f32 %v4119_v44, %v1696_v17 }
 0x939   : > { %v1690_v46 = vmul.f32 %v1655_v52, %v4017_v0  ;;  %1719 = vmatpush.msra.mxu3 %v4132_v51  ;;  %v1615_v40 = vsel %vm1614_vm13, %v4083_v10, %v1611_v54  ;;  %v4174_v10 = vld [vmem:[%s3581_s25 + $0x8] sm:$0xff]  ;;  %s3185_s25 = sshra.s32 %s2644_s27, 4  ;;  %s3186_s25 = int_to_ptr.hbm [resolvable:$true] %s3185_s25 }
 0x93a   : > { %v1619_v37 = vmul.f32 0.5, %v1618_v63  ;;  %v1686_v16 = vmul.f32 %v1615_v40, %v4019_v36  ;;  %s3187_s22 = scalar_lea.hbm %s3186_s25, 1  ;;  %p3192_p0 = scmp.lt.s32.totalorder %s3186_s25, %s4559_s15 }
 0x93b   : > { %v1698_v39 = vmul.f32 %v3157_v25, %v1690_v46  ;;  %1720 = vmatpush.msra.mxu3 %v4140_v47  ;;  %p3188_p11 = scmp.ne.s32.totalorder %s3186_s25, %s3187_s22 }
 0x93c   : > { %v1620_v58 = vsub.f32 1.5, %v1619_v37  ;;  %v1694_v2 = vmul.f32 %v3157_v25, %v1686_v16 }
 0x93d   : > { %v4146_v0 = vadd.f32 %v4119_v44, %v1698_v39  ;;  %p3189_p12 = pnand %p3188_p11, %p3360_p5 }
 0x93e   : > { %v1621_v41 = vmul.f32 %v3138_v62, %v1620_v58  ;;  %v3167_v58 = vld [vmem:[%s4552_s8] ss:$0 sm:$0xff] }
 0x93f   : > { %1721 = vmatpush.msra.mxu3 %v4146_v0  ;;  %p3190_p13 = pneg %p3189_p12 }
 0x940   : > { %v1625_v59 = vsel %vm1624_vm0, %v3138_v62, %v1621_v41 }
 0x941   : > { %v1687_v5 = vmul.f32 %v1625_v59, %v4028_v42  ;;  %1722 = vmatpush.msra.mxu3 %v4152_v3  ;;  %v4165_v42 = vadd.f32 %v4119_v44, %v1694_v2 }
 0x943   : > { %v1695_v36 = vmul.f32 %v3157_v25, %v1687_v5  ;;  %1723 = vmatpush.msra.mxu3 %v4157_v7 }
 0x945   : > { %v4161_v4 = vadd.f32 %v4119_v44, %v1695_v36 }
 0x947   : > { %1724 = vmatpush.msra.mxu3 %v4161_v4 }
 0x949   : > { %1725 = vmatpush.msra.mxu3 %v4165_v42 }
 0x94a   : > { %2804 = vmatmul.msk.f32.vlgmr.msra.gmra.mxu3 %vm845_vm12, %v4169_v6 }
 0x952   : > { %2805 = vmatmul.msk.f32.gmra.mxu3 %vm845_vm12, %v4174_v10 }
 0x95a   : > { %2806 = vmatmul.msk.f32.gmra.mxu3 %vm845_vm12, %v4179_v60 }
 0x962   : > { %2807 = vmatmul.msk.f32.gmra.mxu3 %vm845_vm12, %v4184_v55 }
 0x96a   : > { %2808 = vmatmul.msk.f32.gmra.mxu3 %vm845_vm12, %v4189_v56 }
 0x972   : > { %2809 = vmatmul.msk.f32.gmra.mxu3 %vm845_vm12, %v4194_v57 }
 0x97a   : > { %2810 = vmatmul.msk.f32.gmra.mxu3 %vm845_vm12, %v4199_v9 }
 0x982   : > { %2811 = vmatmul.msk.f32.gmra.mxu3 %vm845_vm12, %v4204_v61 }
 0x9cd   : > { %v1727_v14 = vpop.f32.mrf.mxu3 }
 0x9ce   : > { %1759 = vrot.lane.b32.xlu0 %v1727_v14, %s4577_s16 }
 0x9d5   : > { %v1730_v30 = vpop.f32.mrf.mxu3 }
 0x9d6   : > { %1761 = vrot.lane.b32.xlu2 %v1730_v30, %s4577_s16 }
 0x9dd   : > { %v1733_v45 = vpop.f32.mrf.mxu3 }
 0x9de   : > { %1763 = vrot.lane.b32.xlu1 %v1733_v45, %s4577_s16 }
 0x9e5   : > { %v1736_v33 = vpop.f32.mrf.mxu3 }
 0x9e6   : > { %1765 = vrot.lane.b32.xlu0 %v1736_v33, %s4577_s16 }
 0x9ed   : > { %v1739_v28 = vpop.f32.mrf.mxu3 }
 0x9ee   : > { %1767 = vrot.lane.b32.xlu2 %v1739_v28, %s4577_s16 }
 0x9f5   : > { %v1742_v1 = vpop.f32.mrf.mxu3 }
 0x9f6   : > { %1769 = vrot.lane.b32.xlu0 %v1742_v1, %s4577_s16 }
 0x9fd   : > { %v1745_v29 = vpop.f32.mrf.mxu3 }
 0x9fe   : > { %1771 = vrot.lane.b32.xlu1 %v1745_v29, %s4577_s16 }
 0xa05   : > { %v1748_v24 = vpop.f32.mrf.mxu3 }
 0xa06   : > { %1773 = vrot.lane.b32.xlu2 %v1748_v24, %s4577_s16 }
 0xa30   : > { %v1762_v18 = vpop.permute.xlu2 %1761 }
 0xa31   : > { %v1784_v32 = vsel %vm639_vm1, %v4161_v4, %v1762_v18 }
 0xa40   : > { %v1760_v25 = vpop.permute.xlu0 %1759 }
 0xa41   : > { %v1783_v12 = vsel %vm639_vm1, %v4165_v42, %v1760_v25 }
 0xa42   : > { %2812 = vmatmul.msk.f32.vlgmr.msra.gmra.mxu0 %vm845_vm12, %v1783_v12 }
 0xa48   : > { %v1768_v21 = vpop.permute.xlu2 %1767 }
 0xa49   : > { %v1787_v22 = vsel %vm639_vm1, %v4146_v0, %v1768_v21 }
 0xa4a   : > { %2813 = vmatmul.msk.f32.gmra.mxu0 %vm845_vm12, %v1784_v32 }
 0xa50   : > { %v1764_v15 = vpop.permute.xlu1 %1763 }
 0xa51   : > { %v1785_v26 = vsel %vm639_vm1, %v4157_v7, %v1764_v15 }
 0xa52   : > { %2814 = vmatmul.msk.f32.gmra.mxu0 %vm845_vm12, %v1785_v26 }
 0xa58   : > { %v1766_v34 = vpop.permute.xlu0 %1765 }
 0xa59   : > { %v1786_v62 = vsel %vm639_vm1, %v4152_v3, %v1766_v34 }
 0xa5a   : > { %2815 = vmatmul.msk.f32.gmra.mxu0 %vm845_vm12, %v1786_v62 }
 0xa60   : > { %v1774_v50 = vpop.permute.xlu2 %1773 }
 0xa61   : > { %v1790_v52 = vsel %vm639_vm1, %v4122_v11, %v1774_v50 }
 0xa62   : > { %2816 = vmatmul.msk.f32.gmra.mxu0 %vm845_vm12, %v1787_v22 }
 0xa68   : > { %v1770_v31 = vpop.permute.xlu0 %1769 }
 0xa69   : > { %v1788_v35 = vsel %vm639_vm1, %v4140_v47, %v1770_v31 }
 0xa6a   : > { %2817 = vmatmul.msk.f32.gmra.mxu0 %vm845_vm12, %v1788_v35 }
 0xa70   : > { %v1772_v48 = vpop.permute.xlu1 %1771 }
 0xa71   : > { %v1789_v49 = vsel %vm639_vm1, %v4132_v51, %v1772_v48 }
 0xa72   : > { %2818 = vmatmul.msk.f32.gmra.mxu0 %vm845_vm12, %v1789_v49 }
 0xa7a   : > { %2819 = vmatmul.msk.f32.gmra.mxu0 %vm845_vm12, %v1790_v52 }
 0xabf   : > { %v1832_v54 = vpop.f32.mrf.mxu0 }
 0xac0   : > { %v1833_v1 = vadd.f32 %v3167_v58, %v1832_v54 }
 0xac2   : > { %v1856_v25 = vmax.f32 %v1833_v1, 0.0  ;;  %v2843_v1 = vld [vmem:[%s3859_s23 + $0x78] sm:$0xff] }
 0xac7   : > { %v1835_v63 = vpop.f32.mrf.mxu0 }
 0xac8   : > { %v1836_v33 = vadd.f32 %v3167_v58, %v1835_v63 }
 0xaca   : > { %v1857_v24 = vmax.f32 %v1836_v33, 0.0  ;;  %v2841_v33 = vld [vmem:[%s3859_s23 + $0x68] sm:$0xff] }
 0xacf   : > { %v1838_v19 = vpop.f32.mrf.mxu0 }
 0xad0   : > { %v1839_v30 = vadd.f32 %v3167_v58, %v1838_v19 }
 0xad2   : > { %v1858_v29 = vmax.f32 %v1839_v30, 0.0 }
 0xad7   : > { %v1841_v46 = vpop.f32.mrf.mxu0 }
 0xad8   : > { %v1842_v36 = vadd.f32 %v3167_v58, %v1841_v46 }
 0xada   : > { %v1859_v28 = vmax.f32 %v1842_v36, 0.0  ;;  %v2842_v36 = vld [vmem:[%s3859_s23 + $0x70] sm:$0xff] }
 0xadf   : > { %v1844_v37 = vpop.f32.mrf.mxu0 }
 0xae0   : > { %v1845_v5 = vadd.f32 %v3167_v58, %v1844_v37 }
 0xae2   : > { %v1860_v45 = vmax.f32 %v1845_v5, 0.0 }
 0xae7   : > { %v1847_v38 = vpop.f32.mrf.mxu0 }
 0xae8   : > { %v4247_v16 = vadd.f32 %v3167_v58, %v1847_v38 }
 0xaea   : > { %v1861_v14 = vmax.f32 %v4247_v16, 0.0  ;;  %v2839_v16 = vld [vmem:[%s3859_s23 + $0x58] sm:$0xff] }
 0xaef   : > { %v1850_v39 = vpop.f32.mrf.mxu0 }
 0xaf0   : > { %v4243_v17 = vadd.f32 %v3167_v58, %v1850_v39  ;;  %v2840_v39 = vld [vmem:[%s3859_s23 + $0x60] sm:$0xff] }
 0xaf2   : > { %v1862_v2 = vmax.f32 %v4243_v17, 0.0 }
 0xaf7   : > { %v1853_v40 = vpop.f32.mrf.mxu0 }
 0xaf8   : > { %v4245_v41 = vadd.f32 %v3167_v58, %v1853_v40  ;;  %v3168_v40 = vld [vmem:[%s4554_s10] ss:$0 sm:$0xff] }
 0xafa   : > { %v1863_v59 = vmax.f32 %v4245_v41, 0.0 }
 0xafc   : > { %1872 = vmatpush.msra.mxu1 %v1863_v59 }
 0xafe   : > { %1873 = vmatpush.msra.mxu1 %v1862_v2 }
 0xb00   : > { %1874 = vmatpush.msra.mxu1 %v1861_v14 }
 0xb02   : > { %1875 = vmatpush.msra.mxu1 %v1860_v45 }
 0xb04   : > { %1876 = vmatpush.msra.mxu1 %v1859_v28 }
 0xb06   : > { %1877 = vmatpush.msra.mxu1 %v1858_v29 }
 0xb08   : > { %1878 = vmatpush.msra.mxu1 %v1857_v24 }
 0xb0a   : > { %1879 = vmatpush.msra.mxu1 %v1856_v25 }
 0xb0b   : > { %2820 = vmatmul.msk.f32.vlgmr.msra.gmra.mxu1 %vm845_vm12, %v4169_v6 }
 0xb13   : > { %2821 = vmatmul.msk.f32.gmra.mxu1 %vm845_vm12, %v4174_v10 }
 0xb1b   : > { %2822 = vmatmul.msk.f32.gmra.mxu1 %vm845_vm12, %v4179_v60 }
 0xb23   : > { %2823 = vmatmul.msk.f32.gmra.mxu1 %vm845_vm12, %v4184_v55 }
 0xb2b   : > { %2824 = vmatmul.msk.f32.gmra.mxu1 %vm845_vm12, %v4189_v56 }
 0xb33   : > { %2825 = vmatmul.msk.f32.gmra.mxu1 %vm845_vm12, %v4194_v57 }
 0xb3b   : > { %2826 = vmatmul.msk.f32.gmra.mxu1 %vm845_vm12, %v4199_v9 }
 0xb43   : > { %2827 = vmatmul.msk.f32.gmra.mxu1 %vm845_vm12, %v4204_v61 }
 0xb88   : > { %v1881_v6 = vpop.f32.mrf.mxu1 }
 0xb89   : > { %1913 = vrot.lane.b32.xlu0 %v1881_v6, %s4577_s16 }
 0xb90   : > { %v1884_v10 = vpop.f32.mrf.mxu1 }
 0xb91   : > { %1915 = vrot.lane.b32.xlu1 %v1884_v10, %s4577_s16 }
 0xb98   : > { %v1887_v60 = vpop.f32.mrf.mxu1 }
 0xb99   : > { %1917 = vrot.lane.b32.xlu2 %v1887_v60, %s4577_s16  ;;  %v2836_v60 = vld [vmem:[%s3859_s23 + $0x40] sm:$0xff] }
 0xba0   : > { %v1890_v55 = vpop.f32.mrf.mxu1 }
 0xba1   : > { %1919 = vrot.lane.b32.xlu0 %v1890_v55, %s4577_s16  ;;  %v2838_v55 = vld [vmem:[%s3859_s23 + $0x50] sm:$0xff] }
 0xba8   : > { %v1893_v56 = vpop.f32.mrf.mxu1 }
 0xba9   : > { %1921 = vrot.lane.b32.xlu1 %v1893_v56, %s4577_s16 }
 0xbb0   : > { %v1896_v57 = vpop.f32.mrf.mxu1 }
 0xbb1   : > { %1923 = vrot.lane.b32.xlu2 %v1896_v57, %s4577_s16 }
 0xbb8   : > { %v1899_v9 = vpop.f32.mrf.mxu1 }
 0xbb9   : > { %1925 = vrot.lane.b32.xlu0 %v1899_v9, %s4577_s16 }
 0xbc0   : > { %v1902_v61 = vpop.f32.mrf.mxu1 }
 0xbc1   : > { %1927 = vrot.lane.b32.xlu1 %v1902_v61, %s4577_s16  ;;  %v2837_v61 = vld [vmem:[%s3859_s23 + $0x48] sm:$0xff]  ;;  %s3191_s23 = scalar_lea.hbm %s4559_s15, 4 }
 0xbc2   : > { %p3193_p1 = scmp.lt.s32.totalorder %s3191_s23, %s3187_s22 }
 0xbc4   : > { %p3194_p2 = por %p3193_p1, %p3192_p0 }
 0xbc6   : > { %p3195_p3 = pnand %p3194_p2, %p3190_p13 }
 0xbf3   : > { %v1918_v26 = vpop.permute.xlu2 %1917 }
 0xbf4   : > { %v1939_v34 = vsel %vm639_vm1, %v1858_v29, %v1918_v26 }
 0xbfb   : > { %v1914_v12 = vpop.permute.xlu0 %1913 }
 0xbfc   : > { %v1937_v18 = vsel %vm639_vm1, %v1856_v25, %v1914_v12 }
 0xbfd   : > { %2828 = vmatmul.msk.f32.vlgmr.msrb.gmra.mxu2 %vm845_vm12, %v1937_v18 }
 0xc03   : > { %v1916_v32 = vpop.permute.xlu1 %1915 }
 0xc04   : > { %v1938_v15 = vsel %vm639_vm1, %v1857_v24, %v1916_v32 }
 0xc05   : > { %2829 = vmatmul.msk.f32.gmra.mxu2 %vm845_vm12, %v1938_v15 }
 0xc0b   : > { %v1924_v35 = vpop.permute.xlu2 %1923 }
 0xc0c   : > { %v1942_v48 = vsel %vm639_vm1, %v1861_v14, %v1924_v35 }
 0xc0d   : > { %2830 = vmatmul.msk.f32.gmra.mxu2 %vm845_vm12, %v1939_v34 }
 0xc13   : > { %v1920_v62 = vpop.permute.xlu0 %1919 }
 0xc14   : > { %v1940_v21 = vsel %vm639_vm1, %v1859_v28, %v1920_v62 }
 0xc15   : > { %2831 = vmatmul.msk.f32.gmra.mxu2 %vm845_vm12, %v1940_v21 }
 0xc1b   : > { %v1922_v22 = vpop.permute.xlu1 %1921 }
 0xc1c   : > { %v1941_v31 = vsel %vm639_vm1, %v1860_v45, %v1922_v22 }
 0xc1d   : > { %2832 = vmatmul.msk.f32.gmra.mxu2 %vm845_vm12, %v1941_v31 }
 0xc25   : > { %2833 = vmatmul.msk.f32.gmra.mxu2 %vm845_vm12, %v1942_v48 }
 0xc2b   : > { %v1926_v49 = vpop.permute.xlu0 %1925 }
 0xc2c   : > { %v1943_v50 = vsel %vm639_vm1, %v1862_v2, %v1926_v49 }
 0xc2d   : > { %2834 = vmatmul.msk.f32.gmra.mxu2 %vm845_vm12, %v1943_v50 }
 0xc33   : > { %v1928_v52 = vpop.permute.xlu1 %1927 }
 0xc34   : > { %v1944_v54 = vsel %vm639_vm1, %v1863_v59, %v1928_v52 }
 0xc35   : > { %2835 = vmatmul.msk.f32.gmra.mxu2 %vm845_vm12, %v1944_v54 }
 0xc80   : > { %v1986_v63 = vpop.f32.mrf.mxu2 }
 0xc81   : > { %v1987_v6 = vadd.f32 %v3168_v40, %v1986_v63 }
 0xc83   : > { %v2019_v56 = vadd.f32 %v2836_v60, %v1987_v6 }
 0xc88   : > { %v1989_v19 = vpop.f32.mrf.mxu2 }
 0xc89   : > { %v1990_v9 = vadd.f32 %v3168_v40, %v1989_v19 }
 0xc8b   : > { %v2020_v12 = vadd.f32 %v2837_v61, %v1990_v9 }
 0xc90   : > { %v1992_v46 = vpop.f32.mrf.mxu2 }
 0xc91   : > { %v1993_v10 = vadd.f32 %v3168_v40, %v1992_v46 }
 0xc93   : > { %v2021_v57 = vadd.f32 %v2838_v55, %v1993_v10 }
 0xc98   : > { %v1995_v37 = vpop.f32.mrf.mxu2 }
 0xc99   : > { %v1996_v41 = vadd.f32 %v3168_v40, %v1995_v37 }
 0xc9b   : > { %v2022_v5 = vadd.f32 %v2839_v16, %v1996_v41 }
 0xca0   : > { %v1998_v38 = vpop.f32.mrf.mxu2 }
 0xca1   : > { %v1999_v58 = vadd.f32 %v3168_v40, %v1998_v38 }
 0xca3   : > { %v2023_v17 = vadd.f32 %v2840_v39, %v1999_v58 }
 0xca5   : > { %2043 = vrot.lane.b32.xlu1 %v2023_v17, %s3237_s26 }
 0xca8   : > { %v2001_v59 = vpop.f32.mrf.mxu2 }
 0xca9   : > { %v2002_v45 = vadd.f32 %v3168_v40, %v2001_v59 }
 0xcab   : > { %v2024_v24 = vadd.f32 %v2841_v33, %v2002_v45 }
 0xcad   : > { %2041 = vrot.lane.b32.xlu1 %v2022_v5, %s3237_s26 }
 0xcb0   : > { %v2004_v2 = vpop.f32.mrf.mxu2 }
 0xcb1   : > { %v2005_v14 = vadd.f32 %v3168_v40, %v2004_v2 }
 0xcb3   : > { %v2025_v30 = vadd.f32 %v2842_v36, %v2005_v14 }
 0xcb5   : > { %2047 = vrot.lane.b32.xlu2 %v2025_v30, %s3237_s26 }
 0xcb8   : > { %v2007_v28 = vpop.f32.mrf.mxu2 }
 0xcb9   : > { %v2008_v29 = vadd.f32 %v3168_v40, %v2007_v28 }
 0xcbb   : > { %v2026_v25 = vadd.f32 %v2843_v1, %v2008_v29 }
 0xcbd   : > { %2045 = vrot.lane.b32.xlu2 %v2024_v24, %s3237_s26  ;;  %2049 = vrot.lane.b32.xlu0 %v2026_v25, %s3237_s26 }
 0xcc5   : > { %2035 = vrot.lane.b32.xlu2 %v2019_v56, %s3237_s26  ;;  %2039 = vrot.lane.b32.xlu0 %v2021_v57, %s3237_s26 }
 0xccd   : > { %2037 = vrot.lane.b32.xlu0 %v2020_v12, %s3237_s26 }
 0xd0f   : > { %v2048_v18 = vpop.permute.xlu2 %2047 }
 0xd10   : > { %vm2065_vm4 = vcmp.ge.f32.partialorder %v2025_v30, %v2048_v18 }
 0xd11   : > { %v2850_v22 = vsel %vm2065_vm4, 1.0, %v3239_v13 }
 0xd17   : > { %v2046_v32 = vpop.permute.xlu2 %2045  ;;  %v2044_v15 = vpop.permute.xlu1 %2043 }
 0xd18   : > { %vm2064_vm2 = vcmp.ge.f32.partialorder %v2024_v24, %v2046_v32  ;;  %vm2063_vm3 = vcmp.ge.f32.partialorder %v2023_v17, %v2044_v15 }
 0xd19   : > { %v2849_v26 = vsel %vm2064_vm2, 1.0, %v3239_v13  ;;  %v2848_v34 = vsel %vm2063_vm3, 1.0, %v3239_v13 }
 0xd1a   : > { %v3040_v62 = vpack.i.bf16 %v2849_v26, %v2848_v34 }
 0xd1c   : > { %3041 = vperm.xlu2 %3039, %v3040_v62  }
 0xd1f   : > { %v2042_v48 = vpop.permute.xlu1 %2041  ;;  %v2036_v63 = vpop.permute.xlu2 %2035 }
 0xd20   : > { %vm2062_vm6 = vcmp.ge.f32.partialorder %v2022_v5, %v2042_v48  ;;  %vm2059_vm8 = vcmp.ge.f32.partialorder %v2019_v56, %v2036_v63 }
 0xd21   : > { %v2847_v50 = vsel %vm2062_vm6, 1.0, %v3239_v13  ;;  %v2844_v46 = vsel %vm2059_vm8, 1.0, %v3239_v13 }
 0xd24   : > { %3055 = vset.pattern.permute.xlu2 %v3240_v43 }
 0xd2f   : > { %v2050_v21 = vpop.permute.xlu0 %2049 }
 0xd30   : > { %vm2066_vm5 = vcmp.ge.f32.partialorder %v2026_v25, %v2050_v21 }
 0xd31   : > { %v2851_v31 = vsel %vm2066_vm5, 1.0, %v3239_v13 }
 0xd32   : > { %v3034_v35 = vpack.i.bf16 %v2851_v31, %v2850_v22  ;;  %v2909_v22 = vld [vmem:[%s4555_s11 + $0x30] sm:$0xff] }
 0xd34   : > { %3035 = vperm.xlu1 %3033, %v3034_v35  }
 0xd37   : > { %v2040_v49 = vpop.permute.xlu0 %2039 }
 0xd38   : > { %vm2061_vm7 = vcmp.ge.f32.partialorder %v2021_v57, %v2040_v49 }
 0xd39   : > { %v2846_v52 = vsel %vm2061_vm7, 1.0, %v3239_v13 }
 0xd3a   : > { %v3045_v54 = vpack.i.bf16 %v2847_v50, %v2846_v52 }
 0xd3c   : > { %3046 = vperm.xlu0 %2980, %v3045_v54  }
 0xd3f   : > { %v2038_v19 = vpop.permute.xlu0 %2037 }
 0xd40   : > { %vm2060_vm9 = vcmp.ge.f32.partialorder %v2020_v12, %v2038_v19 }
 0xd41   : > { %v2845_v37 = vsel %vm2060_vm9, 1.0, %v3239_v13 }
 0xd42   : > { %v3056_v38 = vpack.i.bf16 %v2845_v37, %v2844_v46 }
 0xd44   : > { %3051 = vperm.xlu1 %3033, %v3056_v38   ;;  %3057 = vperm.xlu2 %3055, %v3056_v38  }
 0xd45   : > { %3061 = vset.pattern.permute.xlu0 %v3240_v43 }
 0xd46   : > { %3063 = vperm.xlu0 %3061, %v3045_v54  }
 0xd4c   : > { %3067 = vset.pattern.permute.xlu1 %v3240_v43 }
 0xd4d   : > { %3069 = vperm.xlu1 %3067, %v3040_v62  }
 0xd55   : > { %3079 = vperm.xlu1 %3067, %v3034_v35   ;;  %v2908_v35 = vld [vmem:[%s4555_s11 + $0x28] sm:$0xff] }
 0xd76   : > { %v3042_v39 = vpop.permute.xlu2 %3041 }
 0xd77   : > { %v3044_v58 = vunpack.i.h.bf16 %v3042_v39  ;;  %v3043_v17 = vunpack.i.l.bf16 %v3042_v39 }
 0xd79   : > { %v2128_v5 = vmul.f32 %v3044_v58, %v4140_v47  ;;  %v2127_v2 = vmul.f32 %v3043_v17, %v4146_v0 }
 0xd7b   : > { %v2133_v45 = vpack.c.bf16 %v2128_v5, %v2127_v2 }
 0xd9e   : > { %v3058_v56 = vpop.permute.xlu2 %3057 }
 0xd9f   : > { %v3060_v57 = vunpack.i.h.bf16 %v3058_v56  ;;  %v3059_v9 = vunpack.i.l.bf16 %v3058_v56 }
 0xda6   : > { %v3036_v40 = vpop.permute.xlu1 %3035 }
 0xda7   : > { %v3038_v41 = vunpack.i.h.bf16 %v3036_v40  ;;  %v3037_v16 = vunpack.i.l.bf16 %v3036_v40 }
 0xda9   : > { %v2130_v59 = vmul.f32 %v3038_v41, %v4122_v11  ;;  %v2129_v13 = vmul.f32 %v3037_v16, %v4132_v51  ;;  %v2907_v16 = vld [vmem:[%s4555_s11 + $0x20] sm:$0xff] }
 0xdab   : > { %v2134_v36 = vpack.c.bf16 %v2130_v59, %v2129_v13 }
 0xdad   : > { %2139 = vmatpush.bf16.msrb.mxu3 %v2134_v36 }
 0xdae   : > { %v3047_v14 = vpop.permute.xlu0 %3046 }
 0xdaf   : > { %v3049_v43 = vunpack.i.h.bf16 %v3047_v14  ;;  %v3048_v30 = vunpack.i.l.bf16 %v3047_v14 }
 0xdb1   : > { %v2126_v33 = vmul.f32 %v3049_v43, %v4152_v3  ;;  %v2125_v28 = vmul.f32 %v3048_v30, %v4157_v7  ;;  %2140 = vmatpush.bf16.msrb.mxu3 %v2133_v45 }
 0xdb3   : > { %v2132_v1 = vpack.c.bf16 %v2126_v33, %v2125_v28 }
 0xdb5   : > { %2141 = vmatpush.bf16.msrb.mxu3 %v2132_v1 }
 0xdb6   : > { %v3052_v29 = vpop.permute.xlu1 %3051 }
 0xdb7   : > { %v3054_v24 = vunpack.i.h.bf16 %v3052_v29  ;;  %v3053_v25 = vunpack.i.l.bf16 %v3052_v29 }
 0xdb8   : > { %v3064_v15 = vpop.permute.xlu0 %3063 }
 0xdb9   : > { %v2124_v6 = vmul.f32 %v3054_v24, %v4161_v4  ;;  %v2123_v10 = vmul.f32 %v3053_v25, %v4165_v42  ;;  %v3066_v26 = vunpack.i.h.bf16 %v3064_v15 }
 0xdbb   : > { %v2131_v60 = vpack.c.bf16 %v2124_v6, %v2123_v10 }
 0xdbd   : > { %2142 = vmatpush.bf16.msrb.mxu3 %v2131_v60 }
 0xdbf   : > { %v3070_v48 = vpop.permute.xlu1 %3069 }
 0xdc0   : > { %2852 = vmatmul.msk.bf16.vlgmr.msrb.gmra.mxu3 %vm845_vm12, %v3900_v27  ;;  %v3072_v49 = vunpack.i.h.bf16 %v3070_v48  ;;  %v3071_v50 = vunpack.i.l.bf16 %v3070_v48 }
 0xdc7   : > { %v3080_v37 = vpop.permute.xlu1 %3079 }
 0xdc8   : > { %v3082_v38 = vunpack.i.h.bf16 %v3080_v37  ;;  %v3081_v39 = vunpack.i.l.bf16 %v3080_v37 }
 0xdd0   : > { %2853 = vmatmul.msk.bf16.gmra.mxu3 %vm845_vm12, %v3906_v8  ;;  %v3065_v8 = vunpack.i.l.bf16 %v3064_v15 }
 0xde0   : > { %2854 = vmatmul.msk.bf16.gmra.mxu3 %vm845_vm12, %v3912_v23 }
 0xdf0   : > { %2855 = vmatmul.msk.bf16.gmra.mxu3 %vm845_vm12, %v3918_v20  ;;  %v2910_v20 = vld [vmem:[%s4555_s11 + $0x38] sm:$0xff] }
 0xdf1   : > { %2302 = vmatpush.bf16.msrb.mxu0 %v2910_v20 }
 0xdf5   : > { %2303 = vmatpush.bf16.msrb.mxu0 %v2909_v22 }
 0xdf9   : > { %2304 = vmatpush.bf16.msrb.mxu0 %v2908_v35 }
 0xdfd   : > { %2305 = vmatpush.bf16.msrb.mxu0 %v2907_v16 }
 0xe43   : > { %v2144_v55 = vpop.f32.mrf.mxu3 }
 0xe44   : > { %v2196_v12 = vmul.f32 %v3059_v9, %v2144_v55 }
 0xe4b   : > { %v2146_v61 = vpop.f32.mrf.mxu3 }
 0xe4c   : > { %v2197_v18 = vmul.f32 %v3060_v57, %v2146_v61 }
 0xe4e   : > { %v3073_v32 = vpack.i.bf16 %v2197_v18, %v2196_v12  ;;  %v3104_v18 = vld [vmem:[%s4556_s12 + $0x1] ss:$0 sm:$0xff] }
 0xe50   : > { %3074 = vrot.lane.b32.xlu2 %v3073_v32, %s4577_s16 }
 0xe53   : > { %v2149_v27 = vpop.f32.mrf.mxu3 }
 0xe54   : > { %v2198_v62 = vmul.f32 %v3065_v8, %v2149_v27 }
 0xe5b   : > { %v2151_v34 = vpop.f32.mrf.mxu3 }
 0xe5c   : > { %v2199_v23 = vmul.f32 %v3066_v26, %v2151_v34 }
 0xe5e   : > { %v3083_v21 = vpack.i.bf16 %v2199_v23, %v2198_v62 }
 0xe60   : > { %3084 = vrot.lane.b32.xlu2 %v3083_v21, %s4577_s16 }
 0xe63   : > { %v2154_v31 = vpop.f32.mrf.mxu3 }
 0xe64   : > { %v2200_v54 = vmul.f32 %v3071_v50, %v2154_v31 }
 0xe6b   : > { %v2156_v52 = vpop.f32.mrf.mxu3 }
 0xe6c   : > { %v2201_v63 = vmul.f32 %v3072_v49, %v2156_v52 }
 0xe6e   : > { %v3088_v19 = vpack.i.bf16 %v2201_v63, %v2200_v54 }
 0xe70   : > { %3089 = vrot.lane.b32.xlu0 %v3088_v19, %s4577_s16 }
 0xe73   : > { %v2159_v46 = vpop.f32.mrf.mxu3 }
 0xe74   : > { %v2202_v58 = vmul.f32 %v3081_v39, %v2159_v46 }
 0xe7b   : > { %v2161_v40 = vpop.f32.mrf.mxu3 }
 0xe7c   : > { %v2203_v17 = vmul.f32 %v3082_v38, %v2161_v40 }
 0xe7e   : > { %v3093_v41 = vpack.i.bf16 %v2203_v17, %v2202_v58 }
 0xe80   : > { %3094 = vrot.lane.b32.xlu1 %v3093_v41, %s4577_s16 }
 0xeaa   : > { %v3075_v59 = vpop.permute.xlu2 %3074 }
 0xeab   : > { %v3077_v13 = vunpack.i.h.bf16 %v3075_v59  ;;  %v3076_v5 = vunpack.i.l.bf16 %v3075_v59 }
 0xead   : > { %v2237_v2 = vsel %vm639_vm1, %v4161_v4, %v3077_v13  ;;  %v2236_v36 = vsel %vm639_vm1, %v4165_v42, %v3076_v5 }
 0xeae   : > { %v2244_v14 = vpack.c.bf16 %v2237_v2, %v2236_v36 }
 0xeb0   : > { %2881 = vmatmul.msk.bf16.vlgmr.msrb.gmra.mxu0 %vm845_vm12, %v2244_v14 }
 0xeba   : > { %v3085_v43 = vpop.permute.xlu2 %3084 }
 0xebb   : > { %v3087_v30 = vunpack.i.h.bf16 %v3085_v43  ;;  %v3086_v45 = vunpack.i.l.bf16 %v3085_v43 }
 0xebd   : > { %v2238_v33 = vsel %vm639_vm1, %v4157_v7, %v3086_v45  ;;  %v2239_v28 = vsel %vm639_vm1, %v4152_v3, %v3087_v30 }
 0xebe   : > { %v2245_v1 = vpack.c.bf16 %v2239_v28, %v2238_v33 }
 0xec0   : > { %2882 = vmatmul.msk.bf16.gmra.mxu0 %vm845_vm12, %v2245_v1 }
 0xee2   : > { %v3090_v29 = vpop.permute.xlu0 %3089 }
 0xee3   : > { %v3092_v24 = vunpack.i.h.bf16 %v3090_v29  ;;  %v3091_v25 = vunpack.i.l.bf16 %v3090_v29 }
 0xee5   : > { %v2240_v6 = vsel %vm639_vm1, %v4146_v0, %v3091_v25  ;;  %v2241_v10 = vsel %vm639_vm1, %v4140_v47, %v3092_v24 }
 0xee6   : > { %v2246_v60 = vpack.c.bf16 %v2241_v10, %v2240_v6 }
 0xee8   : > { %2883 = vmatmul.msk.bf16.gmra.mxu0 %vm845_vm12, %v2246_v60 }
 0xef2   : > { %v3095_v55 = vpop.permute.xlu1 %3094 }
 0xef3   : > { %v3097_v56 = vunpack.i.h.bf16 %v3095_v55  ;;  %v3096_v57 = vunpack.i.l.bf16 %v3095_v55 }
 0xef5   : > { %v2243_v9 = vsel %vm639_vm1, %v4122_v11, %v3097_v56  ;;  %v2242_v61 = vsel %vm639_vm1, %v4132_v51, %v3096_v57 }
 0xef6   : > { %v2247_v12 = vpack.c.bf16 %v2243_v9, %v2242_v61 }
 0xef8   : > { %2884 = vmatmul.msk.bf16.gmra.mxu0 %vm845_vm12, %v2247_v12 }
 0xf2d   : > { %v2307_v32 = vpop.f32.mrf.mxu0 }
 0xf2e   : > { %v2308_v27 = vadd.f32 %v3104_v18, %v2307_v32 }
 0xf30   : > { %v2327_v15 = vmax.f32 %v2308_v27, 0.0 }
 0xf32   : > { %v2335_v26 = vadd.f32 %v2327_v15, %v4165_v42 }
 0xf34   : > { %v2343_v8 = vsel %vm639_vm1, %v2335_v26, 0.0 }
 0xf35   : > { %v2309_v34 = vpop.f32.mrf.mxu0  ;;  %2344 = vadd.xlane.f32.xlu2 %v2343_v8 }
 0xf36   : > { %v2310_v62 = vadd.f32 %v3104_v18, %v2309_v34 }
 0xf38   : > { %v2328_v23 = vmax.f32 %v2310_v62, 0.0 }
 0xf3a   : > { %v2336_v21 = vadd.f32 %v2328_v23, %v4161_v4 }
 0xf3c   : > { %v2346_v20 = vsel %vm639_vm1, %v2336_v21, 0.0 }
 0xf3d   : > { %v2312_v22 = vpop.f32.mrf.mxu0  ;;  %2347 = vadd.xlane.f32.xlu0 %v2346_v20 }
 0xf3e   : > { %v2313_v31 = vadd.f32 %v3104_v18, %v2312_v22 }
 0xf40   : > { %v2329_v35 = vmax.f32 %v2313_v31, 0.0 }
 0xf42   : > { %v2337_v48 = vadd.f32 %v2329_v35, %v4157_v7 }
 0xf44   : > { %v2349_v49 = vsel %vm639_vm1, %v2337_v48, 0.0 }
 0xf45   : > { %v2314_v50 = vpop.f32.mrf.mxu0  ;;  %2350 = vadd.xlane.f32.xlu1 %v2349_v49  ;;  %v2912_v49 = vld [vmem:[%s4557_s13 + $0x8] sm:$0xff] }
 0xf46   : > { %v2315_v42 = vadd.f32 %v3104_v18, %v2314_v50  ;;  %2573 = vmatpush.bf16.msrb.mxu1 %v2912_v49  ;;  %v4478_v49 = vld [vmem:[%s4550_s6] ss:$0 sm:$0xff] }
 0xf48   : > { %v2330_v52 = vmax.f32 %v2315_v42, 0.0 }
 0xf4a   : > { %v2338_v54 = vadd.f32 %v2330_v52, %v4152_v3  ;;  %v2911_v52 = vld [vmem:[%s4557_s13] sm:$0xff] }
 0xf4b   : > { %2574 = vmatpush.bf16.msrb.mxu1 %v2911_v52 }
 0xf4c   : > { %v2352_v63 = vsel %vm639_vm1, %v2338_v54, 0.0 }
 0xf4d   : > { %2353 = vadd.xlane.f32.xlu2 %v2352_v63 }
 0xf65   : > { %v2317_v4 = vpop.f32.mrf.mxu0 }
 0xf66   : > { %v2318_v19 = vadd.f32 %v3104_v18, %v2317_v4 }
 0xf68   : > { %v2331_v46 = vmax.f32 %v2318_v19, 0.0 }
 0xf6a   : > { %v2339_v37 = vadd.f32 %v2331_v46, %v4146_v0 }
 0xf6c   : > { %v2355_v38 = vsel %vm639_vm1, %v2339_v37, 0.0 }
 0xf6d   : > { %v2319_v39 = vpop.f32.mrf.mxu0  ;;  %2356 = vadd.xlane.f32.xlu0 %v2355_v38 }
 0xf6e   : > { %v2320_v7 = vadd.f32 %v3104_v18, %v2319_v39 }
 0xf70   : > { %v2332_v40 = vmax.f32 %v2320_v7, 0.0 }
 0xf72   : > { %v2340_v58 = vadd.f32 %v2332_v40, %v4140_v47 }
 0xf74   : > { %v2358_v17 = vsel %vm639_vm1, %v2340_v58, 0.0 }
 0xf75   : > { %2359 = vadd.xlane.f32.xlu1 %v2358_v17  ;;  %v2322_v3 = vpop.f32.mrf.mxu0 }
 0xf76   : > { %v2323_v41 = vadd.f32 %v3104_v18, %v2322_v3 }
 0xf78   : > { %v2333_v16 = vmax.f32 %v2323_v41, 0.0 }
 0xf7a   : > { %v2341_v59 = vadd.f32 %v2333_v16, %v4132_v51 }
 0xf7c   : > { %v2361_v13 = vsel %vm639_vm1, %v2341_v59, 0.0 }
 0xf7d   : > { %2362 = vadd.xlane.f32.xlu1 %v2361_v13  ;;  %v2324_v0 = vpop.f32.mrf.mxu0 }
 0xf7e   : > { %v2325_v36 = vadd.f32 %v3104_v18, %v2324_v0 }
 0xf80   : > { %v2334_v43 = vmax.f32 %v2325_v36, 0.0 }
 0xf82   : > { %v2342_v28 = vadd.f32 %v2334_v43, %v4122_v11 }
 0xf84   : > { %v2364_v24 = vsel %vm639_vm1, %v2342_v28, 0.0 }
 0xfa8   : > { %v2345_v5 = vpop.xlane.xlu2 %2344 }
 0xfa9   : > { %v2367_v2 = vmul.f32 %v2345_v5, %v3404_v53 }
 0xfab   : > { %v4400_v14 = vsub.f32 %v2335_v26, %v2367_v2 }
 0xfad   : > { %v2383_v47 = vmul.f32 %v4400_v14, %v4400_v14 }
 0xfaf   : > { %v2391_v30 = vsel %vm639_vm1, %v2383_v47, 0.0 }
 0xfb0   : > { %2392 = vadd.xlane.f32.xlu2 %v2391_v30  ;;  %v2348_v45 = vpop.xlane.xlu0 %2347 }
 0xfb1   : > { %v2368_v51 = vmul.f32 %v2348_v45, %v3404_v53 }
 0xfb3   : > { %v4406_v33 = vsub.f32 %v2336_v21, %v2368_v51 }
 0xfb5   : > { %v2384_v1 = vmul.f32 %v4406_v33, %v4406_v33 }
 0xfb7   : > { %v2394_v29 = vsel %vm639_vm1, %v2384_v1, 0.0 }
 0xfb8   : > { %2395 = vadd.xlane.f32.xlu0 %v2394_v29  ;;  %v2351_v25 = vpop.xlane.xlu1 %2350  ;;  %2365 = vadd.xlane.f32.xlu2 %v2364_v24 }
 0xfb9   : > { %v2369_v6 = vmul.f32 %v2351_v25, %v3404_v53 }
 0xfbb   : > { %v4414_v10 = vsub.f32 %v2337_v48, %v2369_v6 }
 0xfbd   : > { %v2385_v60 = vmul.f32 %v4414_v10, %v4414_v10 }
 0xfbf   : > { %v2397_v55 = vsel %vm639_vm1, %v2385_v60, 0.0  ;;  %v4463_v60 = vld [vmem:[%s4549_s5] ss:$0 sm:$0xff] }
 0xfc0   : > { %v2354_v11 = vpop.xlane.xlu2 %2353  ;;  %2398 = vadd.xlane.f32.xlu0 %v2397_v55 }
 0xfc1   : > { %v2370_v56 = vmul.f32 %v2354_v11, %v3404_v53 }
 0xfc3   : > { %v4420_v57 = vsub.f32 %v2338_v54, %v2370_v56 }
 0xfc5   : > { %v2386_v9 = vmul.f32 %v4420_v57, %v4420_v57 }
 0xfc7   : > { %v2400_v61 = vsel %vm639_vm1, %v2386_v9, 0.0 }
 0xfc8   : > { %2401 = vadd.xlane.f32.xlu1 %v2400_v61 }
 0xfe0   : > { %v2357_v12 = vpop.xlane.xlu0 %2356 }
 0xfe1   : > { %v2371_v18 = vmul.f32 %v2357_v12, %v3404_v53 }
 0xfe3   : > { %v4426_v32 = vsub.f32 %v2339_v37, %v2371_v18 }
 0xfe5   : > { %v2387_v27 = vmul.f32 %v4426_v32, %v4426_v32 }
 0xfe7   : > { %v2403_v15 = vsel %vm639_vm1, %v2387_v27, 0.0 }
 0xfe8   : > { %v2360_v26 = vpop.xlane.xlu1 %2359  ;;  %2404 = vadd.xlane.f32.xlu2 %v2403_v15 }
 0xfe9   : > { %v2372_v8 = vmul.f32 %v2360_v26, %v3404_v53 }
 0xfeb   : > { %v4432_v34 = vsub.f32 %v2340_v58, %v2372_v8 }
 0xfed   : > { %v2388_v62 = vmul.f32 %v4432_v34, %v4432_v34 }
 0xfef   : > { %v2406_v23 = vsel %vm639_vm1, %v2388_v62, 0.0 }
 0xff0   : > { %2407 = vadd.xlane.f32.xlu0 %v2406_v23  ;;  %v2363_v21 = vpop.xlane.xlu1 %2362 }
 0xff1   : > { %v2373_v20 = vmul.f32 %v2363_v21, %v3404_v53 }
 0xff3   : > { %v4438_v22 = vsub.f32 %v2341_v59, %v2373_v20 }
 0xff5   : > { %v2389_v31 = vmul.f32 %v4438_v22, %v4438_v22 }
 0xff7   : > { %v2409_v35 = vsel %vm639_vm1, %v2389_v31, 0.0 }
 0xff8   : > { %2410 = vadd.xlane.f32.xlu1 %v2409_v35 }
0x1023   : > { %v2393_v48 = vpop.xlane.xlu2 %2392 }
0x1024   : > { %v2415_v50 = vmul.f32 %v2393_v48, %v3404_v53 }
0x1026   : > { %v2423_v42 = vadd.f32 1e-05, %v2415_v50 }
0x1028   : > { %3139 = vrsqrt.f32 %v2423_v42  ;;  %vm2437_vm10 = vweird.f32 %v2423_v42 }
0x102b   : > { %v2396_v54 = vpop.xlane.xlu0 %2395  ;;  %v2366_v63 = vpop.xlane.xlu2 %2365 }
0x102c   : > { %v2416_v4 = vmul.f32 %v2396_v54, %v3404_v53  ;;  %v2374_v19 = vmul.f32 %v2366_v63, %v3404_v53 }
0x102e   : > { %v3140_v46 = vpop.eup %3139  ;;  %v2424_v37 = vadd.f32 1e-05, %v2416_v4  ;;  %v4452_v38 = vsub.f32 %v2342_v28, %v2374_v19 }
0x102f   : > { %v2432_v39 = vmul.f32 %v3140_v46, %v2423_v42  ;;  %vm2438_vm12 = vweird.f32 %v3140_v46 }
0x1030   : > { %3141 = vrsqrt.f32 %v2424_v37  ;;  %v2390_v7 = vmul.f32 %v4452_v38, %v4452_v38  ;;  %vm2439_vm11 = vmor %vm2437_vm10, %vm2438_vm12  ;;  %vm2447_vm14 = vweird.f32 %v2424_v37 }
0x1031   : > { %v2433_v40 = vmul.f32 %v3140_v46, %v2432_v39 }
0x1032   : > { %v2412_v58 = vsel %vm639_vm1, %v2390_v7, 0.0 }
0x1033   : > { %v2434_v17 = vmul.f32 0.5, %v2433_v40  ;;  %v2399_v3 = vpop.xlane.xlu0 %2398  ;;  %2413 = vadd.xlane.f32.xlu2 %v2412_v58 }
0x1034   : > { %v2417_v41 = vmul.f32 %v2399_v3, %v3404_v53 }
0x1035   : > { %v2435_v16 = vsub.f32 1.5, %v2434_v17 }
0x1036   : > { %v3142_v59 = vpop.eup %3141  ;;  %v2425_v13 = vadd.f32 1e-05, %v2417_v41 }
0x1037   : > { %v2436_v0 = vmul.f32 %v3140_v46, %v2435_v16  ;;  %v2442_v5 = vmul.f32 %v3142_v59, %v2424_v37  ;;  %vm2448_vm13 = vweird.f32 %v3142_v59 }
0x1038   : > { %3143 = vrsqrt.f32 %v2425_v13  ;;  %vm2449_vm15 = vmor %vm2447_vm14, %vm2448_vm13  ;;  %vm2457_vm2 = vweird.f32 %v2425_v13 }
0x1039   : > { %v2443_v2 = vmul.f32 %v3142_v59, %v2442_v5  ;;  %v2440_v36 = vsel %vm2439_vm11, %v3140_v46, %v2436_v0 }
0x103a   : > { %v2511_v28 = vmul.f32 %v2440_v36, %v4400_v14 }
0x103b   : > { %v2444_v47 = vmul.f32 0.5, %v2443_v2  ;;  %v2402_v43 = vpop.xlane.xlu1 %2401 }
0x103c   : > { %v2418_v30 = vmul.f32 %v2402_v43, %v3404_v53  ;;  %v2519_v55 = vmul.f32 %v4463_v60, %v2511_v28 }
0x103d   : > { %v2445_v45 = vsub.f32 1.5, %v2444_v47 }
0x103e   : > { %v3144_v51 = vpop.eup %3143  ;;  %v2426_v1 = vadd.f32 1e-05, %v2418_v30  ;;  %v2527_v12 = vadd.f32 %v4119_v44, %v2519_v55 }
0x103f   : > { %v2446_v29 = vmul.f32 %v3142_v59, %v2445_v45  ;;  %v2452_v24 = vmul.f32 %v3144_v51, %v2425_v13  ;;  %vm2458_vm0 = vweird.f32 %v3144_v51 }
0x1040   : > { %3145 = vrsqrt.f32 %v2426_v1  ;;  %vm2459_vm3 = vmor %vm2457_vm2, %vm2458_vm0  ;;  %vm2467_vm5 = vweird.f32 %v2426_v1 }
0x1041   : > { %v2450_v25 = vsel %vm2449_vm15, %v3142_v59, %v2446_v29  ;;  %v2453_v6 = vmul.f32 %v3144_v51, %v2452_v24 }
0x1042   : > { %v2512_v11 = vmul.f32 %v2450_v25, %v4406_v33 }
0x1043   : > { %v2454_v56 = vmul.f32 0.5, %v2453_v6 }
0x1044   : > { %v2520_v14 = vmul.f32 %v4463_v60, %v2512_v11 }
0x1045   : > { %v2455_v9 = vsub.f32 1.5, %v2454_v56 }
0x1046   : > { %v3146_v61 = vpop.eup %3145  ;;  %v2528_v18 = vadd.f32 %v4119_v44, %v2520_v14 }
0x1047   : > { %v2456_v27 = vmul.f32 %v3144_v51, %v2455_v9  ;;  %v2462_v15 = vmul.f32 %v3146_v61, %v2426_v1  ;;  %vm2468_vm4 = vweird.f32 %v3146_v61 }
0x1048   : > { %v2535_v26 = vpack.c.bf16 %v2528_v18, %v2527_v12  ;;  %vm2469_vm6 = vmor %vm2467_vm5, %vm2468_vm4  ;;  %vm2596_vm4 = vcmask 64512   ;;  %vm2628_vm5 = vcmask 57344  }
0x1049   : > { %v2463_v8 = vmul.f32 %v3146_v61, %v2462_v15  ;;  %v2460_v62 = vsel %vm2459_vm3, %v3144_v51, %v2456_v27 }
0x104a   : > { %2893 = vmatmul.msk.bf16.vlgmr.msrb.gmra.mxu1 %vm639_vm1, %v2535_v26  ;;  %v2513_v21 = vmul.f32 %v2460_v62, %v4414_v10 }
0x104b   : > { %v2464_v33 = vmul.f32 0.5, %v2463_v8 }
0x104c   : > { %v2521_v35 = vmul.f32 %v4463_v60, %v2513_v21 }
0x104d   : > { %v2465_v23 = vsub.f32 1.5, %v2464_v33 }
0x104e   : > { %v2529_v50 = vadd.f32 %v4478_v49, %v2521_v35 }
0x104f   : > { %v2466_v20 = vmul.f32 %v3146_v61, %v2465_v23 }
0x1051   : > { %v2470_v31 = vsel %vm2469_vm6, %v3146_v61, %v2466_v20 }
0x1052   : > { %v2514_v44 = vmul.f32 %v2470_v31, %v4420_v57 }
0x1054   : > { %v2522_v48 = vmul.f32 %v4463_v60, %v2514_v44 }
0x1056   : > { %v2530_v42 = vadd.f32 %v4478_v49, %v2522_v48 }
0x1058   : > { %v2536_v10 = vpack.c.bf16 %v2530_v42, %v2529_v50 }
0x105a   : > { %2894 = vmatmul.msk.bf16.gmra.mxu1 %vm639_vm1, %v2536_v10  ;;  %v3241_v10 = vmov 64.0  }
0x105b   : > { %v2405_v52 = vpop.xlane.xlu2 %2404 }
0x105c   : > { %v2419_v54 = vmul.f32 %v2405_v52, %v3404_v53 }
0x105e   : > { %v2427_v57 = vadd.f32 1e-05, %v2419_v54 }
0x1060   : > { %3147 = vrsqrt.f32 %v2427_v57  ;;  %vm2477_vm8 = vweird.f32 %v2427_v57 }
0x1063   : > { %v2408_v63 = vpop.xlane.xlu0 %2407 }
0x1064   : > { %v2420_v4 = vmul.f32 %v2408_v63, %v3404_v53 }
0x1066   : > { %v3148_v19 = vpop.eup %3147  ;;  %v2428_v46 = vadd.f32 1e-05, %v2420_v4 }
0x1067   : > { %v2472_v37 = vmul.f32 %v3148_v19, %v2427_v57  ;;  %vm2478_vm7 = vweird.f32 %v3148_v19 }
0x1068   : > { %3149 = vrsqrt.f32 %v2428_v46  ;;  %vm2479_vm9 = vmor %vm2477_vm8, %vm2478_vm7  ;;  %vm2487_vm10 = vweird.f32 %v2428_v46 }
0x1069   : > { %v2473_v39 = vmul.f32 %v3148_v19, %v2472_v37 }
0x106b   : > { %v2474_v7 = vmul.f32 0.5, %v2473_v39  ;;  %v2411_v28 = vpop.xlane.xlu1 %2410 }
0x106d   : > { %v2475_v40 = vsub.f32 1.5, %v2474_v7 }
0x106e   : > { %v3150_v58 = vpop.eup %3149 }
0x106f   : > { %v2476_v17 = vmul.f32 %v3148_v19, %v2475_v40  ;;  %v2482_v3 = vmul.f32 %v3150_v58, %v2428_v46  ;;  %vm2488_vm12 = vweird.f32 %v3150_v58 }
0x1070   : > { %vm2489_vm11 = vmor %vm2487_vm10, %vm2488_vm12 }
0x1071   : > { %v2483_v41 = vmul.f32 %v3150_v58, %v2482_v3  ;;  %v2480_v16 = vsel %vm2479_vm9, %v3148_v19, %v2476_v17 }
0x1072   : > { %v2515_v0 = vmul.f32 %v2480_v16, %v4426_v32  ;;  %v2421_v32 = vmul.f32 %v2411_v28, %v3404_v53 }
0x1073   : > { %v2484_v59 = vmul.f32 0.5, %v2483_v41 }
0x1074   : > { %v2523_v47 = vmul.f32 %v4463_v60, %v2515_v0  ;;  %v2429_v1 = vadd.f32 1e-05, %v2421_v32 }
0x1075   : > { %v2485_v13 = vsub.f32 1.5, %v2484_v59 }
0x1076   : > { %v2531_v30 = vadd.f32 %v4478_v49, %v2523_v47  ;;  %3151 = vrsqrt.f32 %v2429_v1  ;;  %vm2497_vm14 = vweird.f32 %v2429_v1 }
0x1077   : > { %v2486_v5 = vmul.f32 %v3150_v58, %v2485_v13 }
0x1079   : > { %v2490_v2 = vsel %vm2489_vm11, %v3150_v58, %v2486_v5 }
0x107a   : > { %v2516_v36 = vmul.f32 %v2490_v2, %v4432_v34 }
0x107c   : > { %v2524_v43 = vmul.f32 %v4463_v60, %v2516_v36  ;;  %v3152_v29 = vpop.eup %3151 }
0x107d   : > { %v2492_v24 = vmul.f32 %v3152_v29, %v2429_v1  ;;  %vm2498_vm13 = vweird.f32 %v3152_v29 }
0x107e   : > { %v2532_v45 = vadd.f32 %v4478_v49, %v2524_v43  ;;  %vm2499_vm15 = vmor %vm2497_vm14, %vm2498_vm13 }
0x107f   : > { %v2493_v25 = vmul.f32 %v3152_v29, %v2492_v24 }
0x1080   : > { %v2537_v51 = vpack.c.bf16 %v2532_v45, %v2531_v30 }
0x1081   : > { %v2494_v11 = vmul.f32 0.5, %v2493_v25 }
0x1082   : > { %2895 = vmatmul.msk.bf16.gmra.mxu1 %vm639_vm1, %v2537_v51  ;;  %v2626_v51 = vld [vmem:[%s4558_s14] sm:$0x1] }
0x1083   : > { %v2495_v56 = vsub.f32 1.5, %v2494_v11 }
0x1085   : > { %v2496_v9 = vmul.f32 %v3152_v29, %v2495_v56 }
0x1087   : > { %v2500_v18 = vsel %vm2499_vm15, %v3152_v29, %v2496_v9 }
0x1088   : > { %v2517_v26 = vmul.f32 %v2500_v18, %v4438_v22 }
0x108a   : > { %v2525_v33 = vmul.f32 %v4463_v60, %v2517_v26 }
0x108c   : > { %v2533_v21 = vadd.f32 %v4478_v49, %v2525_v33 }
0x10a6   : > { %v2414_v34 = vpop.xlane.xlu2 %2413 }
0x10a7   : > { %v2422_v6 = vmul.f32 %v2414_v34, %v3404_v53 }
0x10a9   : > { %v2430_v55 = vadd.f32 1e-05, %v2422_v6 }
0x10ab   : > { %3153 = vrsqrt.f32 %v2430_v55  ;;  %vm2507_vm2 = vweird.f32 %v2430_v55 }
0x10ac   : > { %3155 = vrcp.f32 %v3241_v10 }
0x10b1   : > { %v3154_v14 = vpop.eup %3153 }
0x10b2   : > { %v2502_v61 = vmul.f32 %v3154_v14, %v2430_v55  ;;  %vm2508_vm0 = vweird.f32 %v3154_v14  ;;  %v3156_v19 = vpop.eup %3155 }
0x10b3   : > { %vm2509_vm3 = vmor %vm2507_vm2, %vm2508_vm0  ;;  %v2619_v40 = vmul.f32 64.0, %v3156_v19 }
0x10b4   : > { %v2503_v12 = vmul.f32 %v3154_v14, %v2502_v61 }
0x10b5   : > { %v2620_v16 = vsub.f32 1.0, %v2619_v40 }
0x10b6   : > { %v2504_v27 = vmul.f32 0.5, %v2503_v12 }
0x10b7   : > { %v2621_v0 = vmul.f32 %v3156_v19, %v2620_v16 }
0x10b8   : > { %v2505_v15 = vsub.f32 1.5, %v2504_v27 }
0x10b9   : > { %v2622_v36 = vadd.f32 %v3156_v19, %v2621_v0 }
0x10ba   : > { %v2506_v8 = vmul.f32 %v3154_v14, %v2505_v15 }
0x10bc   : > { %v2510_v53 = vsel %vm2509_vm3, %v3154_v14, %v2506_v8 }
0x10bd   : > { %v2518_v62 = vmul.f32 %v2510_v53, %v4452_v38 }
0x10bf   : > { %v2526_v23 = vmul.f32 %v4463_v60, %v2518_v62 }
0x10c1   : > { %v2534_v20 = vadd.f32 %v4478_v49, %v2526_v23 }
0x10c3   : > { %v2538_v31 = vpack.c.bf16 %v2534_v20, %v2533_v21 }
0x10c5   : > { %2896 = vmatmul.msk.bf16.gmra.mxu1 %vm639_vm1, %v2538_v31  ;;  %vm2623_vm1 = vweird.f32 %v3156_v19 }
0x10c6   : > { %v2624_v30 = vsel %vm2623_vm1, %v3156_v19, %v2622_v36 }
0x10c7   : > { %v2576_v44 = vpop.f32.mrf.mxu1 }
0x10c8   : > { %v2597_v60 = vsel %vm2596_vm4, %v2576_v44, 0.0 }
0x10cf   : > { %v2578_v35 = vpop.f32.mrf.mxu1 }
0x10d0   : > { %v2598_v38 = vsel %vm2596_vm4, %v2578_v35, 0.0 }
0x10d1   : > { %v2599_v54 = vadd.f32 %v2598_v38, %v2597_v60 }
0x10d7   : > { %v2581_v22 = vpop.f32.mrf.mxu1 }
0x10d8   : > { %v2600_v52 = vsel %vm2596_vm4, %v2581_v22, 0.0 }
0x10d9   : > { %v2601_v57 = vadd.f32 %v2600_v52, %v2599_v54 }
0x10df   : > { %v2583_v48 = vpop.f32.mrf.mxu1 }
0x10e0   : > { %v2602_v49 = vsel %vm2596_vm4, %v2583_v48, 0.0 }
0x10e1   : > { %v2603_v46 = vadd.f32 %v2602_v49, %v2601_v57 }
0x10ff   : > { %v2586_v50 = vpop.f32.mrf.mxu1 }
0x1100   : > { %v2604_v4 = vsel %vm2596_vm4, %v2586_v50, 0.0 }
0x1101   : > { %v2605_v39 = vadd.f32 %v2604_v4, %v2603_v46 }
0x1107   : > { %v2588_v42 = vpop.f32.mrf.mxu1 }
0x1108   : > { %v2606_v37 = vsel %vm2596_vm4, %v2588_v42, 0.0 }
0x1109   : > { %v2607_v58 = vadd.f32 %v2606_v37, %v2605_v39 }
0x1142   : > { %v2591_v63 = vpop.f32.mrf.mxu1 }
0x1143   : > { %v2608_v7 = vsel %vm2596_vm4, %v2591_v63, 0.0 }
0x1144   : > { %v2609_v17 = vadd.f32 %v2608_v7, %v2607_v58 }
0x114a   : > { %v2593_v3 = vpop.f32.mrf.mxu1 }
0x114b   : > { %v2610_v41 = vsel %vm2596_vm4, %v2593_v3, 0.0 }
0x114c   : > { %v2611_v59 = vadd.f32 %v2610_v41, %v2609_v17 }
0x114e   : > { %v2612_v13 = vrot.slane %v2611_v59, 4 }
0x1150   : > { %v2613_v5 = vadd.f32 %v2612_v13, %v2611_v59 }
0x1152   : > { %v2614_v2 = vrot.slane %v2613_v5, 2 }
0x1154   : > { %v2615_v47 = vadd.f32 %v2614_v2, %v2613_v5 }
0x1156   : > { %v2616_v43 = vrot.slane %v2615_v47, 1 }
0x1158   : > { %v2617_v45 = vadd.f32 %v2616_v43, %v2615_v47 }
0x115a   : > { %v2625_v28 = vmul.f32 %v2624_v30, %v2617_v45 }
0x115c   : > { %v2627_v32 = vadd.f32 %v2626_v51, %v2625_v28 }
0x115e   : > { %2629 = vst.msk [vmem:[%s516_s1] sm:$0x1] %vm2628_vm5, %v2627_v32 }
0x115f   : > { %3198 = shalt.err (!%p3195_p3)
}
0x1160   : > { %2922 = dma.vmem_to_hbm [thread:$0]  (%p3360_p5), %s2642_s3, 16, %s2644_s27, %s2631_s4  }
0x1161 PF: > { %p2928_p4 = scmp.ge.s32.totalorder %s3233_s21, 2  ;;  %s2655_s17 = sand.u32 1, %s3221_s18  }
0x1162   : > { %s2656_s1 = scalar_lea.sflag [#allocation3], %s2655_s17 }
0x1163   : > { %p2925_p7 = pnand %p2928_p4, %p3364_p6 }
0x1165   : > { %p2926_p8 = pneg %p2925_p7 }
0x1167   : > { %3216 = dma.done.wait (%p2926_p8), %s2656_s1, 16  }
0x1168   : > { %3218 = vsyncadd (%p2926_p8), %s2656_s1, 4294967280  ;;  %s4586_s25 = sld [smem:[#allocation5_spill]]  ;;  %p25_p9 = scmp.ge.s32.totalorder %s3347_s24, 6  }
0x1169   : > { %s4587_s18 = smov %s3225_s19  ;;  %s4588_s19 = smov %s3229_s20 }
0x116a   : > { %s4590_s21 = smov %s3347_s24  ;;  %27 = sbr.rel (!%p25_p9) target bundleno = 8 (0x8), region = 124 }
0x116e   : > { %s4589_s20 = smov %s4586_s25 }
0x116f   :  { %2661 = vsyncpa [#allocation3], 1 }
0x1170   :  { %2663 = vsyncpa [#allocation3 + $0x1], 1 }

</bundles_post_ra>
